<compile_context>
chip_gen: v7x
topology: tpu7x:2x2x1
jax: 0.10.0
libtpu: 0.0.40
codegen_flags: <defaults>
</compile_context>

<pallas_src>
from functools import partial

import numpy as np
import jax
import jax.numpy as jnp
from jax.experimental import pallas as pl
from jax.experimental.pallas import tpu as pltpu


# ----------------------------------------------------------------------------
# Per-generation hardware defaults (VMEM capacity, MXU row target)
# ----------------------------------------------------------------------------
_HW_DEFAULTS = None


def _hw_defaults():
    global _HW_DEFAULTS
    if _HW_DEFAULTS is None:
        try:
            kind = jax.devices()[0].device_kind.lower()
        except Exception:
            kind = ""
        if "v7" in kind or "7x" in kind:
            _HW_DEFAULTS = (64 * 2**20, 256)     # v7x: 64 MiB VMEM / TC
        elif "v5" in kind:
            _HW_DEFAULTS = (128 * 2**20, 128)    # v5e: 128 MiB, 128-wide MXU
        elif "v6" in kind:
            _HW_DEFAULTS = (128 * 2**20, 256)    # v6e
        else:
            _HW_DEFAULTS = (64 * 2**20, 256)     # conservative default
    return _HW_DEFAULTS


def _padded_bytes(shape, dtype):
    s = [int(d) for d in shape]
    s[-1] = -(-s[-1] // 128) * 128
    if len(s) >= 2:
        s[-2] = -(-s[-2] // 8) * 8
    n = 1
    for d in s:
        n *= d
    return n * jnp.dtype(dtype).itemsize


def _vmem_limit(working_set_bytes, vmem_cap):
    return int(min(int(0.9 * vmem_cap),
                   max(32 * 2**20, int(1.5 * working_set_bytes))))


# ----------------------------------------------------------------------------
# Pallas kernels
# ----------------------------------------------------------------------------
def _bilerp_kron_kernel(x_ref, k_ref, o_ref):
    """Fused bilinear upsample as one lane-dense matmul.

    x_ref: (bc, H*W)           channel block, flattened spatial (lane-dense)
    k_ref: (H*W, Hout*Wout)    kron(wh, ww)^T interpolation matrix
    o_ref: (bc, Hout*Wout)     lane-dense output (unmasked vst)
    """
    o_ref[...] = jnp.dot(x_ref[...], k_ref[...],
                         preferred_element_type=jnp.float32).astype(o_ref.dtype)


def _bilerp_sep_kernel(x_ref, wwt_ref, wh_ref, o_ref, *, bc, h_in, h_out):
    """Separable bilinear upsample for a block of channels.

    x_ref:  (bc*h_in, W)       channel block pre-merged by the wrapper
    wwt_ref:(W, Wout)          column-interp matrix (already transposed)
    wh_ref: (h_out, h_in)      row-interp matrix
    o_ref:  (bc*h_out, Wout)
    """
    # Single stacked W-direction matmul with M = bc*h_in (MXU-friendly).
    t = jnp.dot(x_ref[...], wwt_ref[...], preferred_element_type=jnp.float32)
    t = t.astype(x_ref.dtype)            # keep the 2nd matmul in native dtype
    wh = wh_ref[...]
    for j in range(bc):                  # small static unroll (bc <= 16)
        tj = t[j * h_in:(j + 1) * h_in, :]
        o_ref[j * h_out:(j + 1) * h_out, :] = jnp.dot(
            wh, tj, preferred_element_type=jnp.float32).astype(o_ref.dtype)


def _ctgn_fused_kernel(x_ref, w_ref, p_ref, o_ref, *, gb, eps):
    """Fused ConvTranspose2d(k=2,s=2) + bias + GroupNorm for gb groups.

    x_ref: (1, Ci, HW)      image n, channels x flattened spatial
    w_ref: (R, Ci)          R = gb*Cg*4 weight rows (row = (g*Cg+cg)*4+ki*2+kj)
    p_ref: (3, R, 1)        packed [bias, gamma, beta] (f32, tap-replicated)
    o_ref: (1, R, HW)       pre-shuffle output (HW lane-dense)
    """
    x = x_ref[0]                                                   # (Ci, HW)
    w = w_ref[...]                                                 # (R, Ci)
    p = p_ref[...]                                                 # (3, R, 1)
    y = jnp.dot(w, x, preferred_element_type=jnp.float32) + p[0]   # (R, HW) f32

    r, hw = y.shape
    cg4 = r // gb
    inv_n = 1.0 / float(cg4 * hw)

    # Single-pass GroupNorm statistics: lane row-sums then tiny one-hot
    # matmuls for the per-group reduce / broadcast (no reshapes/relayouts).
    s1 = jnp.sum(y, axis=1, keepdims=True)                         # (R, 1)
    s2 = jnp.sum(y * y, axis=1, keepdims=True)                     # (R, 1)

    gi = jax.lax.broadcasted_iota(jnp.int32, (gb, r), 0)
    ri = jax.lax.broadcasted_iota(jnp.int32, (gb, r), 1)
    gather = (ri // cg4 == gi).astype(jnp.float32)                 # (gb, R)
    ri2 = jax.lax.broadcasted_iota(jnp.int32, (r, gb), 0)
    gi2 = jax.lax.broadcasted_iota(jnp.int32, (r, gb), 1)
    spread = (ri2 // cg4 == gi2).astype(jnp.float32)               # (R, gb)

    mean_g = jnp.dot(gather, s1, preferred_element_type=jnp.float32) * inv_n
    ex2_g = jnp.dot(gather, s2, preferred_element_type=jnp.float32) * inv_n
    var_g = jnp.maximum(ex2_g - mean_g * mean_g, 0.0)
    rstd_g = jax.lax.rsqrt(var_g + eps)                            # (gb, 1)

    mean_r = jnp.dot(spread, mean_g, preferred_element_type=jnp.float32)
    rstd_r = jnp.dot(spread, rstd_g, preferred_element_type=jnp.float32)

    scale = rstd_r * p[1]                                          # (R, 1)
    shift = p[2] - mean_r * scale
    o_ref[0] = (y * scale + shift).astype(o_ref.dtype)


def _ctgn_tiled_kernel(x_ref, w_ref, p_ref, y_ref, st_ref):
    """Spatially tiled conv-transpose + bias, emitting per-tile GN statistics.

    x_ref:  (1, Ci, hwT)    spatial tile
    w_ref:  (R, Ci)
    p_ref:  (3, R, 1)       only the bias plane is used here
    y_ref:  (1, R, hwT)     un-normalized conv output
    st_ref: (1, 1, R, 2)    per-row (sum, sum-of-squares) for this tile
    """
    x = x_ref[0]
    y = jnp.dot(w_ref[...], x, preferred_element_type=jnp.float32) + p_ref[0]
    y_ref[0] = y.astype(y_ref.dtype)
    s1 = jnp.sum(y, axis=1, keepdims=True)
    s2 = jnp.sum(y * y, axis=1, keepdims=True)
    st_ref[0, 0] = jnp.concatenate([s1, s2], axis=1)


# ----------------------------------------------------------------------------
# Interpolation matrices (exact PyTorch bilinear/align_corners=False semantics)
# ----------------------------------------------------------------------------
def _bilinear_matrix(in_size, out_size):
    m = np.zeros((out_size, in_size), np.float32)
    scale = in_size / out_size
    for p in range(out_size):
        r = (p + 0.5) * scale - 0.5
        r = max(r, 0.0)
        i0 = int(np.floor(r))
        lam = r - i0
        i1 = min(i0 + 1, in_size - 1)
        m[p, i0] += 1.0 - lam
        m[p, i1] += lam
    return m


# ----------------------------------------------------------------------------
# Bilinear upsample wrapper
# ----------------------------------------------------------------------------
_KRON_BYTES_CAP = 8 * 2**20     # dense kron matrix allowed up to 8 MiB


def bilinear_upsample(x, scale, *, force_separable=False):
    """x: (N, C, H, W) -> (N, C, H*scale, W*scale), bilinear, align_corners=False."""
    N, C, H, W = x.shape
    Hout, Wout = int(round(H * scale)), int(round(W * scale))
    HWi, HWo = H * W, Hout * Wout
    NC = N * C
    isz = jnp.dtype(x.dtype).itemsize
    vmem_cap, _ = _hw_defaults()
    budget = int(0.45 * vmem_cap)

    wh = _bilinear_matrix(H, Hout)            # (Hout, H) f32 numpy
    ww = _bilinear_matrix(W, Wout)            # (Wout, W) f32 numpy

    # ---- path 1: single lane-dense Kronecker matmul (small spatial maps) ----
    def kron_step_bytes(bc):
        return (2 * _padded_bytes((bc, HWi), x.dtype)
                + 2 * _padded_bytes((bc, HWo), x.dtype)
                + _padded_bytes((HWi, HWo), x.dtype)
                + bc * HWo * 4)

    kron_cands = [d for d in range(1, NC + 1)
                  if NC % d == 0 and (d % 8 == 0 or d == NC)
                  and kron_step_bytes(d) <= budget]
    use_kron = (not force_separable) and (HWi * HWo * isz <= _KRON_BYTES_CAP) \
        and bool(kron_cands)

    if use_kron:
        bc = max(kron_cands)
        kmat = jnp.asarray(np.kron(wh, ww).T, dtype=x.dtype)      # (HWi, HWo)
        x2 = x.reshape(NC, HWi)
        out = pl.pallas_call(
            _bilerp_kron_kernel,
            out_shape=jax.ShapeDtypeStruct((NC, HWo), x.dtype),
            grid=(NC // bc,),
            in_specs=[
                pl.BlockSpec((bc, HWi), lambda i: (i, 0)),
                pl.BlockSpec((HWi, HWo), lambda i: (0, 0)),
            ],
            out_specs=pl.BlockSpec((bc, HWo), lambda i: (i, 0)),
            compiler_params=pltpu.CompilerParams(
                dimension_semantics=("parallel",),
                vmem_limit_bytes=_vmem_limit(kron_step_bytes(bc), vmem_cap)),
        )(x2, kmat)
        return out.reshape(N, C, Hout, Wout)

    # ---- path 2: separable (large spatial maps / forced) ---------------------
    assert H % 8 == 0 and Hout % 8 == 0, \
        "TODO(synk): separable bilerp path assumes H and Hout are multiples of 8"
    wwt_d = jnp.asarray(ww.T, dtype=x.dtype)                      # (W, Wout)
    wh_d = jnp.asarray(wh, dtype=x.dtype)                         # (Hout, H)

    def sep_step_bytes(bc):
        return (2 * _padded_bytes((bc * H, W), x.dtype)
                + 2 * _padded_bytes((bc * Hout, Wout), x.dtype)
                + _padded_bytes((W, Wout), x.dtype)
                + _padded_bytes((Hout, H), x.dtype)
                + bc * H * Wout * 4)

    cap = 16                                 # bound the per-channel unroll
    sep_cands = [d for d in range(1, min(NC, cap) + 1)
                 if NC % d == 0 and sep_step_bytes(d) <= budget]
    bc = max(sep_cands) if sep_cands else 1

    x2 = x.reshape(NC * H, W)                # free metadata reshape in HBM
    out = pl.pallas_call(
        partial(_bilerp_sep_kernel, bc=bc, h_in=H, h_out=Hout),
        out_shape=jax.ShapeDtypeStruct((NC * Hout, Wout), x.dtype),
        grid=(NC // bc,),
        in_specs=[
            pl.BlockSpec((bc * H, W), lambda i: (i, 0)),
            pl.BlockSpec((W, Wout), lambda i: (0, 0)),
            pl.BlockSpec((Hout, H), lambda i: (0, 0)),
        ],
        out_specs=pl.BlockSpec((bc * Hout, Wout), lambda i: (i, 0)),
        compiler_params=pltpu.CompilerParams(
            dimension_semantics=("parallel",),
            vmem_limit_bytes=_vmem_limit(sep_step_bytes(bc), vmem_cap)),
    )(x2, wwt_d, wh_d)
    return out.reshape(N, C, Hout, Wout)


# ----------------------------------------------------------------------------
# ConvTranspose2d(2,2,stride=2) + GroupNorm wrapper
# ----------------------------------------------------------------------------
def _pack_ct_gn_params(ct_w, ct_b, gn_g, gn_b):
    """Repack ConvTranspose2d + GroupNorm params.

    ct_w: (Ci, Co, 2, 2) -> w_rows (Co*4, Ci), row = co*4 + ki*2 + kj
    bias/gamma/beta -> one packed (3, Co*4, 1) f32 block (tap-replicated).
    """
    Ci, Co, KH, KW = ct_w.shape
    assert (KH, KW) == (2, 2)
    w_rows = jnp.transpose(ct_w, (1, 2, 3, 0)).reshape(Co * 4, Ci)
    rep = lambda v: jnp.repeat(v.astype(jnp.float32), 4)
    packed = jnp.stack([rep(ct_b), rep(gn_g), rep(gn_b)]).reshape(3, Co * 4, 1)
    return w_rows, packed


def conv_transpose2x2_groupnorm(x, w_rows, packed, num_groups, eps,
                                *, force_hw_tile=None):
    """Fused ConvTranspose2d(Ci, Co, 2, 2, stride=2) + bias + GroupNorm(G, Co).

    x: (N, Ci, H, W) -> (N, Co, 2H, 2W)
    """
    N, Ci, H, W = x.shape
    Co4 = w_rows.shape[0]
    Co = Co4 // 4
    G = num_groups
    assert Co % G == 0, "GroupNorm groups must divide channels"
    Cg4 = Co4 // G
    HW = H * W
    vmem_cap, mxu_m = _hw_defaults()
    budget = int(0.45 * vmem_cap)

    x3 = x.reshape(N, Ci, HW)
    w_rows = w_rows.astype(x.dtype)

    def step_bytes(gb, hw_blk):
        R = gb * Cg4
        return (2 * _padded_bytes((1, Ci, hw_blk), x.dtype)
                + 2 * _padded_bytes((R, Ci), x.dtype)
                + 2 * _padded_bytes((3, R, 1), jnp.float32)
                + 2 * _padded_bytes((1, R, hw_blk), x.dtype)
                + 2 * _padded_bytes((1, 1, R, 2), jnp.float32)
                + 2 * R * hw_blk * 4)                      # f32 temporaries

    def pick_gb(hw_blk):
        feas = [gb for gb in range(1, G + 1)
                if G % gb == 0 and ((gb * Cg4) % 8 == 0 or gb == G)
                and step_bytes(gb, hw_blk) <= budget]
        if not feas:
            return None
        hit = [gb for gb in feas if gb * Cg4 >= mxu_m]     # smallest that fills MXU
        return min(hit) if hit else max(feas)

    gb = pick_gb(HW) if force_hw_tile is None else None

    if gb is not None:
        # ---- fused single-pass path ----------------------------------------
        R = gb * Cg4
        y = pl.pallas_call(
            partial(_ctgn_fused_kernel, gb=gb, eps=eps),
            out_shape=jax.ShapeDtypeStruct((N, Co4, HW), x.dtype),
            grid=(N, G // gb),
            in_specs=[
                pl.BlockSpec((1, Ci, HW), lambda n, g: (n, 0, 0)),
                pl.BlockSpec((R, Ci), lambda n, g: (g, 0)),
                pl.BlockSpec((3, R, 1), lambda n, g: (0, g, 0)),
            ],
            out_specs=pl.BlockSpec((1, R, HW), lambda n, g: (n, g, 0)),
            compiler_params=pltpu.CompilerParams(
                dimension_semantics=("parallel", "parallel"),
                vmem_limit_bytes=_vmem_limit(step_bytes(gb, HW), vmem_cap)),
        )(x3, w_rows, packed)
    else:
        # ---- spatially tiled two-pass path (v7x / large shapes) -------------
        hwt = force_hw_tile
        if hwt is None:
            for cand in (8192, 4096, 2048, 1024, 512, 256, 128):
                if HW % cand == 0 and pick_gb(cand) is not None:
                    hwt = cand
                    break
        assert hwt is not None and HW % hwt == 0 and hwt % 128 == 0, \
            "TODO(synk): need a finer HW tiling for this shape"
        gb = pick_gb(hwt)
        assert gb is not None, "TODO(synk): shape too large for this tiling"
        R = gb * Cg4
        T = HW // hwt

        y, st = pl.pallas_call(
            _ctgn_tiled_kernel,
            out_shape=(jax.ShapeDtypeStruct((N, Co4, HW), x.dtype),
                       jax.ShapeDtypeStruct((N, T, Co4, 2), jnp.float32)),
            grid=(N, T, G // gb),
            in_specs=[
                pl.BlockSpec((1, Ci, hwt), lambda n, t, g: (n, 0, t)),
                pl.BlockSpec((R, Ci), lambda n, t, g: (g, 0)),
                pl.BlockSpec((3, R, 1), lambda n, t, g: (0, g, 0)),
            ],
            out_specs=(
                pl.BlockSpec((1, R, hwt), lambda n, t, g: (n, g, t)),
                pl.BlockSpec((1, 1, R, 2), lambda n, t, g: (n, t, g, 0)),
            ),
            compiler_params=pltpu.CompilerParams(
                dimension_semantics=("parallel", "arbitrary", "arbitrary"),
                vmem_limit_bytes=_vmem_limit(step_bytes(gb, hwt), vmem_cap)),
        )(x3, w_rows, packed)

        # Tiny per-(n, group) stats; normalize+affine gets fused by XLA into
        # the pixel-shuffle read/write pass below (no extra HBM pass on y).
        s = st.sum(axis=1)                                    # (N, Co4, 2)
        s1 = s[..., 0].reshape(N, G, Cg4).sum(-1)
        s2 = s[..., 1].reshape(N, G, Cg4).sum(-1)
        cnt = float(Cg4 * HW)
        mean = s1 / cnt
        var = jnp.maximum(s2 / cnt - mean * mean, 0.0)
        rstd = jax.lax.rsqrt(var + eps)                       # (N, G)
        gam = packed[1, :, 0].reshape(G, Cg4)
        bet = packed[2, :, 0].reshape(G, Cg4)
        scale = (gam[None] * rstd[..., None]).reshape(N, Co4, 1)
        shift = (bet[None] - gam[None] * (mean * rstd)[..., None]).reshape(N, Co4, 1)
        y = (y.astype(jnp.float32) * scale + shift).astype(x.dtype)

    # Single pixel-shuffle interleave back to NCHW (one XLA pass).
    # TODO(synk): an in-kernel NCHW write needs stride-2 lane interleaves.
    out = y.reshape(N, Co, 2, 2, H, W).transpose(0, 1, 4, 2, 5, 3)
    return out.reshape(N, Co, 2 * H, 2 * W)


# ----------------------------------------------------------------------------
# Nearest mask resize (trivial gather — kernels were pure overhead here)
# ----------------------------------------------------------------------------
def nearest_resize_mask(mask, out_hw):
    N, Hm, Wm = mask.shape
    Hf, Wf = out_hw
    ri = jnp.floor(jnp.arange(Hf) * (Hm / Hf)).astype(jnp.int32)
    ci = jnp.floor(jnp.arange(Wf) * (Wm / Wf)).astype(jnp.int32)
    return mask[:, ri][:, :, ci] != 0


# ----------------------------------------------------------------------------
# ViTUp.forward equivalent
# ----------------------------------------------------------------------------
def vit_up_forward(features, mask, params, in_features, scale_factors,
                   num_groups=32, eps=1e-5):
    w_rows, packed = _pack_ct_gn_params(params["ct_w"], params["ct_b"],
                                        params["gn_g"], params["gn_b"])
    outputs = {}
    for name, scale in zip(in_features, scale_factors):
        f = features[name]                              # (N, embed_dim, H, W)
        if scale != 1:
            f = bilinear_upsample(f, scale)
        f = conv_transpose2x2_groupnorm(f, w_rows, packed, num_groups, eps)
        f_mask = nearest_resize_mask(mask, f.shape[-2:]) if mask is not None else None
        f_pos = None  # TODO(synk): position_encoding is None by default in ViTUp
        outputs[name] = (f, f_mask, f_pos)
    return outputs


# ----------------------------------------------------------------------------
# Plain-JAX references (numerical sanity check only)
# ----------------------------------------------------------------------------
def _ref_conv_gn(x, ct_w, ct_b, gn_g, gn_b, num_groups, eps):
    N, Ci, H, W = x.shape
    Co = ct_w.shape[1]
    t = jnp.einsum('nchw,cokl->nohkwl', x.astype(jnp.float32),
                   ct_w.astype(jnp.float32))
    t = t.reshape(N, Co, 2 * H, 2 * W) + ct_b.reshape(1, Co, 1, 1)
    tg = t.reshape(N, num_groups, -1)
    mu = tg.mean(-1, keepdims=True)
    var = jnp.square(tg - mu).mean(-1, keepdims=True)
    tn = ((tg - mu) * jax.lax.rsqrt(var + eps)).reshape(N, Co, 2 * H, 2 * W)
    return tn * gn_g.reshape(1, Co, 1, 1) + gn_b.reshape(1, Co, 1, 1)


# ----------------------------------------------------------------------------
# Demo
# ----------------------------------------------------------------------------
if __name__ == "__main__":
    N, EMBED, H, W = 2, 32, 16, 16
    HIDDEN = 64                      # divisible by 32 for GroupNorm(32, .)
    GROUPS, EPS = 32, 1e-5
    in_features = ("p_hi", "p_lo")
    scale_factors = (2.0, 1.0)

    key = jax.random.PRNGKey(0)
    k1, k2, k3, k4, k5, k6, k7 = jax.random.split(key, 7)

    params = {
        "ct_w": 0.02 * jax.random.normal(k1, (EMBED, HIDDEN, 2, 2), jnp.float32),
        "ct_b": 0.02 * jax.random.normal(k2, (HIDDEN,), jnp.float32),
        "gn_g": 1.0 + 0.1 * jax.random.normal(k3, (HIDDEN,), jnp.float32),
        "gn_b": 0.1 * jax.random.normal(k4, (HIDDEN,), jnp.float32),
    }
    features = {
        "p_hi": jax.random.normal(k5, (N, EMBED, H, W), jnp.float32),
        "p_lo": jax.random.normal(k6, (N, EMBED, H, W), jnp.float32),
    }
    mask = jax.random.uniform(k7, (N, H, W)) > 0.7   # bool padding mask

    outputs = vit_up_forward(features, mask, params, in_features, scale_factors,
                             num_groups=GROUPS, eps=EPS)
    for leaf in jax.tree_util.tree_leaves(outputs):
        jax.block_until_ready(leaf)

    # shape sanity
    assert outputs["p_hi"][0].shape == (N, HIDDEN, 64, 64)
    assert outputs["p_lo"][0].shape == (N, HIDDEN, 32, 32)
    assert outputs["p_hi"][1].shape == (N, 64, 64) and outputs["p_hi"][1].dtype == jnp.bool_
    assert outputs["p_lo"][1].shape == (N, 32, 32)

    # numerical sanity vs. plain-JAX reference (f32 path)
    for name, scale in zip(in_features, scale_factors):
        f = features[name].astype(jnp.float32)
        if scale != 1:
            wh_j = jnp.asarray(_bilinear_matrix(f.shape[-2], int(f.shape[-2] * scale)))
            wwt_j = jnp.asarray(_bilinear_matrix(f.shape[-1], int(f.shape[-1] * scale)).T)
            f = jnp.einsum('ph,nchw,wq->ncpq', wh_j, f, wwt_j)
        ref = _ref_conv_gn(f, params["ct_w"], params["ct_b"],
                           params["gn_g"], params["gn_b"], GROUPS, EPS)
        got = outputs[name][0].astype(jnp.float32)
        assert bool(jnp.allclose(got, ref, atol=2e-3, rtol=2e-3)), (
            name, float(jnp.max(jnp.abs(got - ref))))

    # alternate-path checks: separable bilerp and spatially tiled conv+GN
    w_rows, packed = _pack_ct_gn_params(params["ct_w"], params["ct_b"],
                                        params["gn_g"], params["gn_b"])
    f_up = bilinear_upsample(features["p_hi"], 2.0)
    f_up_sep = bilinear_upsample(features["p_hi"], 2.0, force_separable=True)
    assert bool(jnp.allclose(f_up, f_up_sep, atol=1e-3, rtol=1e-3)), (
        float(jnp.max(jnp.abs(f_up - f_up_sep))))
    y_tiled = conv_transpose2x2_groupnorm(f_up, w_rows, packed, GROUPS, EPS,
                                          force_hw_tile=128)
    assert bool(jnp.allclose(y_tiled, outputs["p_hi"][0], atol=2e-3, rtol=2e-3)), (
        float(jnp.max(jnp.abs(y_tiled - outputs["p_hi"][0]))))

    # bf16 smoke test (native-dtype MXU path with f32 accumulation)
    feats_bf16 = {k: v.astype(jnp.bfloat16) for k, v in features.items()}
    out_bf16 = vit_up_forward(feats_bf16, mask, params, in_features, scale_factors,
                              num_groups=GROUPS, eps=EPS)
    jax.block_until_ready(out_bf16["p_hi"][0])
    assert out_bf16["p_hi"][0].dtype == jnp.bfloat16
    assert out_bf16["p_hi"][0].shape == (N, HIDDEN, 64, 64)

    print("KERNEL_OK")
</pallas_src>

<mosaic_0001>
module attributes {stable_mosaic.version = 11 : i64} {
  func.func @_bilerp_kron_kernel(%arg0: i32, %arg1: memref<64x256xf32, #tpu.memory_space<vmem>>, %arg2: memref<256x1024xf32, #tpu.memory_space<vmem>>, %arg3: memref<64x1024xf32, #tpu.memory_space<vmem>>) attributes {dimension_semantics = [#tpu.dimension_semantics<parallel>], iteration_bounds = array<i64: 1>, scalar_prefetch = 0 : i64, scratch_operands = 0 : i64, tpu.core_type = #tpu.core_type<tc>, window_params = [{transform_indices = @transform_0, window_bounds = array<i64: 64, 256>}, {pipeline_mode = #tpu.pipeline_mode<synchronous>, transform_indices = @transform_1, window_bounds = array<i64: 256, 1024>}, {transform_indices = @transform_2, window_bounds = array<i64: 64, 1024>}]} {
    %c0 = arith.constant 0 : index
    %c0_0 = arith.constant 0 : index
    %0 = vector.load %arg1[%c0, %c0_0] : memref<64x256xf32, #tpu.memory_space<vmem>>, vector<64x256xf32>
    %c0_1 = arith.constant 0 : index
    %c0_2 = arith.constant 0 : index
    %1 = vector.load %arg2[%c0_1, %c0_2] : memref<256x1024xf32, #tpu.memory_space<vmem>>, vector<256x1024xf32>
    %cst = arith.constant dense<0.000000e+00> : vector<64x1024xf32>
    %2 = tpu.matmul %0, %1, %cst {dimension_numbers = #tpu.dot_dimension_numbers<[1], [0], [0], [1], [0, 0, 1, 1], [], []>} : vector<64x256xf32>, vector<256x1024xf32>, vector<64x1024xf32> -> vector<64x1024xf32>
    %c0_3 = arith.constant 0 : index
    %c0_4 = arith.constant 0 : index
    %3 = vector.load %arg3[%c0_3, %c0_4] : memref<64x1024xf32, #tpu.memory_space<vmem>>, vector<64x1024xf32>
    tpu.vector_store %arg3[%c0_3, %c0_4], %2 {strides = array<i32>} : memref<64x1024xf32, #tpu.memory_space<vmem>>, vector<64x1024xf32>,
    return
  }
  func.func @transform_0(%arg0: i32) -> (i32, i32) {
    %c0_i32 = arith.constant 0 : i32
    %c0_i32_0 = arith.constant 0 : i32
    return %arg0, %c0_i32 : i32, i32
  }
  func.func @transform_1(%arg0: i32) -> (i32, i32) {
    %c0_i32 = arith.constant 0 : i32
    %c0_i32_0 = arith.constant 0 : i32
    %c0_i32_1 = arith.constant 0 : i32
    return %c0_i32, %c0_i32_0 : i32, i32
  }
  func.func @transform_2(%arg0: i32) -> (i32, i32) {
    %c0_i32 = arith.constant 0 : i32
    %c0_i32_0 = arith.constant 0 : i32
    return %arg0, %c0_i32 : i32, i32
  }
}

</mosaic_0001>

<bundles_post_ra>
// kernel: tpu_custom_call.1
= control target key start
LH: loop header
LB: loop body
LE: loop exit
PB: predicated region body
PF: predicated region fallthrough
CT: control target
= control target key end

     0   :  { %7 = vsyncpa [#allocation3], 0  ;;  %s1341_s0 = inlined_call_operand.hbm [shape: f32[64,256], index: 0, kind: input, shape index: {}]   ;;  %s1342_s1 = inlined_call_operand.hbm [shape: f32[256,1024], index: 1, kind: input, shape index: {}]   ;;  %s1343_s2 = inlined_call_operand.hbm [shape: f32[64,1024], index: 2, kind: output, shape index: {}]  }
   0x1   :  { %8 = vsyncpa [#allocation6], 0 }
   0x2   :  { %9 = vsyncpa [#allocation4], 0  ;;  %s1181_s9 = smov [#allocation2]   ;;  %s1109_s13 = scalar_lea.hbm %s1341_s0, 2048 }
   0x3   :  { %s15_s10 = sshll.u32 %s1181_s9, 4  ;;  %p1110_p0 = scmp.ne.s32.totalorder %s1341_s0, %s1109_s13  ;;  %s16_s10 = int_to_ptr.vmem [resolvable:$true] %s15_s10 }
   0x4   :  { %p1113_p1 = scmp.lt.u32.totalorder %s1109_s13, %s1341_s0 }
   0x6   :  { %p1115_p2 = pnand %p1113_p1, %p1110_p0 }
   0x8   :  { %1118 = shalt.err (!%p1115_p2)
}
   0x9   :  { %s1119_s18 = scalar_lea.vmem %s16_s10, 2048  ;;  %p1124_p4 = scmp.lt.s32.totalorder %s16_s10, %s16_s10 }
   0xa   :  { %p1120_p3 = scmp.ne.s32.totalorder %s16_s10, %s1119_s18  ;;  %p1125_p5 = scmp.lt.s32.totalorder %s1119_s18, %s1119_s18 }
   0xc   :  { %p1126_p6 = por %p1125_p5, %p1124_p4 }
   0xe   :  { %p1127_p7 = pnand %p1126_p6, %p1120_p3 }
  0x10   :  { %1130 = shalt.err (!%p1127_p7)
}
  0x11   :  { %s1182_s19 = smov 256   ;;  %s1183_s20 = smov 16  }
  0x12   :  { %21 = dma.hbm_to_vmem [thread:$0]  %s1341_s0, 2048, %s16_s10, [#allocation3], %s1182_s19, %s1182_s19, %s1183_s20  }
  0x13   :  { %s1184_s23 = smov [#allocation5]   ;;  %s1131_s27 = scalar_lea.hbm %s1342_s1, 32768 }
  0x14   :  { %s27_s24 = sshll.u32 %s1184_s23, 4  ;;  %p1132_p8 = scmp.ne.s32.totalorder %s1342_s1, %s1131_s27  ;;  %s28_s24 = int_to_ptr.vmem [resolvable:$true] %s27_s24 }
  0x15   :  { %p1135_p9 = scmp.lt.u32.totalorder %s1131_s27, %s1342_s1 }
  0x17   :  { %p1137_p10 = pnand %p1135_p9, %p1132_p8 }
  0x19   :  { %1140 = shalt.err (!%p1137_p10)
}
  0x1a   :  { %s1141_s4 = scalar_lea.vmem %s28_s24, 32768  ;;  %p1146_p12 = scmp.lt.s32.totalorder %s28_s24, %s28_s24 }
  0x1b   :  { %p1142_p11 = scmp.ne.s32.totalorder %s28_s24, %s1141_s4  ;;  %p1147_p13 = scmp.lt.s32.totalorder %s1141_s4, %s1141_s4 }
  0x1d   :  { %p1148_p0 = por %p1147_p13, %p1146_p12 }
  0x1f   :  { %p1149_p1 = pnand %p1148_p0, %p1142_p11 }
  0x21   :  { %1152 = shalt.err (!%p1149_p1)
}
  0x22   :  { %s1185_s0 = smov 1024   ;;  %s1186_s5 = smov 64  }
  0x23   :  { %33 = dma.hbm_to_vmem [thread:$0]  %s1342_s1, 32768, %s28_s24, [#allocation6], %s1185_s0, %s1185_s0, %s1186_s5  }
  0x24   :  { %1175 = dma.done.wait [#allocation3], 2048  }
  0x25   :  { %1176 = vsyncadd [#allocation3], 4294965248 }
  0x26   :  { %1177 = dma.done.wait [#allocation6], 32768  }
  0x27   :  { %1178 = vsyncadd [#allocation6], 4294934528  ;;  %v57_v0 = vld [vmem:[#allocation5 + $0x8] sm:$0xff]  ;;  %v59_v2 = vld [vmem:[#allocation5 + $0x18] sm:$0xff]  ;;  %s1187_s1 = smov [#allocation7]  }
  0x28   :  { %v65_v1 = vld [vmem:[#allocation5 + $0x48] sm:$0xff]  ;;  %v67_v4 = vld [vmem:[#allocation5 + $0x58] sm:$0xff]  ;;  %v56_v5 = vld [vmem:[#allocation5] sm:$0xff]  ;;  %s833_s8 = sshll.u32 %s1187_s1, 4  ;;  %s834_s8 = int_to_ptr.vmem [resolvable:$true] %s833_s8 }
  0x29   :  { %v846_v3 = vpack.c.bf16 %v65_v1, %v57_v0  ;;  %v64_v6 = vld [vmem:[#allocation5 + $0x40] sm:$0xff]  ;;  %v910_v7 = vpack.c.bf16 %v67_v4, %v59_v2  ;;  %v58_v9 = vld [vmem:[#allocation5 + $0x10] sm:$0xff]  ;;  %v73_v11 = vld [vmem:[#allocation5 + $0x88] sm:$0xff]  ;;  %s1153_s9 = scalar_lea.vmem %s834_s8, 8192  ;;  %p1158_p3 = scmp.lt.s32.totalorder %s834_s8, %s834_s8 }
  0x2a   :  { %v848_v8 = vpack.c.bf16 %v64_v6, %v56_v5  ;;  %v66_v10 = vld [vmem:[#allocation5 + $0x50] sm:$0xff]  ;;  %v81_v13 = vld [vmem:[#allocation5 + $0xc8] sm:$0xff]  ;;  %v75_v14 = vld [vmem:[#allocation5 + $0x98] sm:$0xff]  ;;  %p1154_p2 = scmp.ne.s32.totalorder %s834_s8, %s1153_s9  ;;  %p1159_p4 = scmp.lt.s32.totalorder %s1153_s9, %s1153_s9 }
  0x2b   :  { %847 = vmatprep.subr.bf16.mxu0 %v846_v3  ;;  %v912_v12 = vpack.c.bf16 %v66_v10, %v58_v9  ;;  %v83_v15 = vld [vmem:[#allocation5 + $0xd8] sm:$0xff]  ;;  %911 = vmatprep.subr.bf16.mxu1 %v910_v7  ;;  %v850_v16 = vpack.c.bf16 %v81_v13, %v73_v11  ;;  %v72_v18 = vld [vmem:[#allocation5 + $0x80] sm:$0xff]  ;;  %v74_v20 = vld [vmem:[#allocation5 + $0x90] sm:$0xff] }
  0x2c   :  { %849 = vmatpush1.bf16.msra.mxu0 %v848_v8  ;;  %v914_v17 = vpack.c.bf16 %v83_v15, %v75_v14  ;;  %v80_v19 = vld [vmem:[#allocation5 + $0xc0] sm:$0xff]  ;;  %v82_v22 = vld [vmem:[#allocation5 + $0xd0] sm:$0xff]  ;;  %v89_v23 = vld [vmem:[#allocation5 + $0x108] sm:$0xff]  ;;  %p1160_p5 = por %p1159_p4, %p1158_p3 }
  0x2d   :  { %913 = vmatpush1.bf16.msra.mxu1 %v912_v12  ;;  %v852_v21 = vpack.c.bf16 %v80_v19, %v72_v18  ;;  %v97_v24 = vld [vmem:[#allocation5 + $0x148] sm:$0xff]  ;;  %851 = vmatprep.subr.bf16.mxu0 %v850_v16  ;;  %v916_v25 = vpack.c.bf16 %v82_v22, %v74_v20  ;;  %v91_v27 = vld [vmem:[#allocation5 + $0x118] sm:$0xff]  ;;  %v88_v29 = vld [vmem:[#allocation5 + $0x100] sm:$0xff] }
  0x2e   :  { %915 = vmatprep.subr.bf16.mxu1 %v914_v17  ;;  %v854_v26 = vpack.c.bf16 %v97_v24, %v89_v23  ;;  %v99_v28 = vld [vmem:[#allocation5 + $0x158] sm:$0xff]  ;;  %v96_v31 = vld [vmem:[#allocation5 + $0x140] sm:$0xff]  ;;  %v90_v32 = vld [vmem:[#allocation5 + $0x110] sm:$0xff]  ;;  %p1161_p6 = pnand %p1160_p5, %p1154_p2 }
  0x2f   :  { %v918_v30 = vpack.c.bf16 %v99_v28, %v91_v27  ;;  %v98_v33 = vld [vmem:[#allocation5 + $0x150] sm:$0xff]  ;;  %v856_v34 = vpack.c.bf16 %v96_v31, %v88_v29  ;;  %v105_v35 = vld [vmem:[#allocation5 + $0x188] sm:$0xff]  ;;  %v107_v37 = vld [vmem:[#allocation5 + $0x198] sm:$0xff] }
  0x30   :  { %853 = vmatpush1.bf16.msra.mxu0 %v852_v21  ;;  %v113_v36 = vld [vmem:[#allocation5 + $0x1c8] sm:$0xff]  ;;  %v920_v38 = vpack.c.bf16 %v98_v33, %v90_v32  ;;  %v115_v40 = vld [vmem:[#allocation5 + $0x1d8] sm:$0xff]  ;;  %v104_v41 = vld [vmem:[#allocation5 + $0x180] sm:$0xff] }
  0x31   :  { %917 = vmatpush1.bf16.msra.mxu1 %v916_v25  ;;  %855 = vmatprep.subr.bf16.mxu0 %v854_v26  ;;  %v858_v39 = vpack.c.bf16 %v113_v36, %v105_v35  ;;  %v112_v42 = vld [vmem:[#allocation5 + $0x1c0] sm:$0xff]  ;;  %v922_v43 = vpack.c.bf16 %v115_v40, %v107_v37  ;;  %v106_v44 = vld [vmem:[#allocation5 + $0x190] sm:$0xff]  ;;  %v121_v46 = vld [vmem:[#allocation5 + $0x208] sm:$0xff] }
  0x32   :  { %919 = vmatprep.subr.bf16.mxu1 %v918_v30  ;;  %v114_v45 = vld [vmem:[#allocation5 + $0x1d0] sm:$0xff]  ;;  %v129_v47 = vld [vmem:[#allocation5 + $0x248] sm:$0xff]  ;;  %v123_v48 = vld [vmem:[#allocation5 + $0x218] sm:$0xff]  ;;  %v860_v50 = vpack.c.bf16 %v112_v42, %v104_v41 }
  0x33   :  { %v131_v49 = vld [vmem:[#allocation5 + $0x258] sm:$0xff]  ;;  %v924_v51 = vpack.c.bf16 %v114_v45, %v106_v44  ;;  %v862_v52 = vpack.c.bf16 %v129_v47, %v121_v46  ;;  %v120_v53 = vld [vmem:[#allocation5 + $0x200] sm:$0xff]  ;;  %v122_v55 = vld [vmem:[#allocation5 + $0x210] sm:$0xff] }
  0x34   :  { %857 = vmatpush1.bf16.msra.mxu0 %v856_v34  ;;  %v128_v54 = vld [vmem:[#allocation5 + $0x240] sm:$0xff]  ;;  %v926_v56 = vpack.c.bf16 %v131_v49, %v123_v48  ;;  %v130_v57 = vld [vmem:[#allocation5 + $0x250] sm:$0xff]  ;;  %v137_v58 = vld [vmem:[#allocation5 + $0x288] sm:$0xff] }
  0x35   :  { %921 = vmatpush1.bf16.msra.mxu1 %v920_v38  ;;  %859 = vmatprep.subr.bf16.mxu0 %v858_v39  ;;  %v145_v59 = vld [vmem:[#allocation5 + $0x2c8] sm:$0xff]  ;;  %v139_v60 = vld [vmem:[#allocation5 + $0x298] sm:$0xff]  ;;  %v864_v62 = vpack.c.bf16 %v128_v54, %v120_v53  ;;  %v928_v63 = vpack.c.bf16 %v130_v57, %v122_v55  ;;  %v136_v1 = vld [vmem:[#allocation5 + $0x280] sm:$0xff] }
  0x36   :  { %923 = vmatprep.subr.bf16.mxu1 %v922_v43  ;;  %v147_v61 = vld [vmem:[#allocation5 + $0x2d8] sm:$0xff]  ;;  %v866_v0 = vpack.c.bf16 %v145_v59, %v137_v58  ;;  %v144_v2 = vld [vmem:[#allocation5 + $0x2c0] sm:$0xff]  ;;  %v138_v3 = vld [vmem:[#allocation5 + $0x290] sm:$0xff] }
  0x37   :  { %v930_v4 = vpack.c.bf16 %v147_v61, %v139_v60  ;;  %v146_v5 = vld [vmem:[#allocation5 + $0x2d0] sm:$0xff]  ;;  %v153_v6 = vld [vmem:[#allocation5 + $0x308] sm:$0xff]  ;;  %v155_v8 = vld [vmem:[#allocation5 + $0x318] sm:$0xff]  ;;  %v868_v10 = vpack.c.bf16 %v144_v2, %v136_v1 }
  0x38   :  { %861 = vmatpush1.bf16.msra.mxu0 %v860_v50  ;;  %v161_v7 = vld [vmem:[#allocation5 + $0x348] sm:$0xff]  ;;  %v163_v9 = vld [vmem:[#allocation5 + $0x358] sm:$0xff]  ;;  %v932_v11 = vpack.c.bf16 %v146_v5, %v138_v3  ;;  %v152_v13 = vld [vmem:[#allocation5 + $0x300] sm:$0xff] }
  0x39   :  { %925 = vmatpush1.bf16.msra.mxu1 %v924_v51  ;;  %863 = vmatprep.subr.bf16.mxu0 %v862_v52  ;;  %v870_v12 = vpack.c.bf16 %v161_v7, %v153_v6  ;;  %v160_v14 = vld [vmem:[#allocation5 + $0x340] sm:$0xff]  ;;  %v154_v15 = vld [vmem:[#allocation5 + $0x310] sm:$0xff]  ;;  %v934_v16 = vpack.c.bf16 %v163_v9, %v155_v8  ;;  %v169_v18 = vld [vmem:[#allocation5 + $0x388] sm:$0xff] }
  0x3a   :  { %927 = vmatprep.subr.bf16.mxu1 %v926_v56  ;;  %v162_v17 = vld [vmem:[#allocation5 + $0x350] sm:$0xff]  ;;  %v177_v19 = vld [vmem:[#allocation5 + $0x3c8] sm:$0xff]  ;;  %v171_v20 = vld [vmem:[#allocation5 + $0x398] sm:$0xff]  ;;  %v872_v22 = vpack.c.bf16 %v160_v14, %v152_v13 }
  0x3b   :  { %v179_v21 = vld [vmem:[#allocation5 + $0x3d8] sm:$0xff]  ;;  %v936_v23 = vpack.c.bf16 %v162_v17, %v154_v15  ;;  %v874_v24 = vpack.c.bf16 %v177_v19, %v169_v18  ;;  %v168_v25 = vld [vmem:[#allocation5 + $0x380] sm:$0xff]  ;;  %v170_v27 = vld [vmem:[#allocation5 + $0x390] sm:$0xff] }
  0x3c   :  { %865 = vmatpush1.bf16.msra.mxu0 %v864_v62  ;;  %v176_v26 = vld [vmem:[#allocation5 + $0x3c0] sm:$0xff]  ;;  %v938_v28 = vpack.c.bf16 %v179_v21, %v171_v20  ;;  %v178_v29 = vld [vmem:[#allocation5 + $0x3d0] sm:$0xff]  ;;  %v185_v30 = vld [vmem:[#allocation5 + $0x408] sm:$0xff] }
  0x3d   :  { %929 = vmatpush1.bf16.msra.mxu1 %v928_v63  ;;  %867 = vmatprep.subr.bf16.mxu0 %v866_v0  ;;  %v193_v31 = vld [vmem:[#allocation5 + $0x448] sm:$0xff]  ;;  %v187_v32 = vld [vmem:[#allocation5 + $0x418] sm:$0xff]  ;;  %v876_v34 = vpack.c.bf16 %v176_v26, %v168_v25  ;;  %v940_v35 = vpack.c.bf16 %v178_v29, %v170_v27  ;;  %v184_v37 = vld [vmem:[#allocation5 + $0x400] sm:$0xff] }
  0x3e   :  { %931 = vmatprep.subr.bf16.mxu1 %v930_v4  ;;  %v195_v33 = vld [vmem:[#allocation5 + $0x458] sm:$0xff]  ;;  %v878_v36 = vpack.c.bf16 %v193_v31, %v185_v30  ;;  %v192_v38 = vld [vmem:[#allocation5 + $0x440] sm:$0xff]  ;;  %v186_v39 = vld [vmem:[#allocation5 + $0x410] sm:$0xff] }
  0x3f   :  { %v942_v40 = vpack.c.bf16 %v195_v33, %v187_v32  ;;  %v194_v41 = vld [vmem:[#allocation5 + $0x450] sm:$0xff]  ;;  %v201_v42 = vld [vmem:[#allocation5 + $0x488] sm:$0xff]  ;;  %v203_v44 = vld [vmem:[#allocation5 + $0x498] sm:$0xff]  ;;  %v880_v46 = vpack.c.bf16 %v192_v38, %v184_v37 }
  0x40   :  { %869 = vmatpush1.bf16.msra.mxu0 %v868_v10  ;;  %v209_v43 = vld [vmem:[#allocation5 + $0x4c8] sm:$0xff]  ;;  %v211_v45 = vld [vmem:[#allocation5 + $0x4d8] sm:$0xff]  ;;  %v944_v47 = vpack.c.bf16 %v194_v41, %v186_v39  ;;  %v200_v49 = vld [vmem:[#allocation5 + $0x480] sm:$0xff] }
  0x41   :  { %933 = vmatpush1.bf16.msra.mxu1 %v932_v11  ;;  %871 = vmatprep.subr.bf16.mxu0 %v870_v12  ;;  %v882_v48 = vpack.c.bf16 %v209_v43, %v201_v42  ;;  %v208_v50 = vld [vmem:[#allocation5 + $0x4c0] sm:$0xff]  ;;  %v202_v51 = vld [vmem:[#allocation5 + $0x490] sm:$0xff]  ;;  %v946_v52 = vpack.c.bf16 %v211_v45, %v203_v44  ;;  %v217_v54 = vld [vmem:[#allocation5 + $0x508] sm:$0xff] }
  0x42   :  { %935 = vmatprep.subr.bf16.mxu1 %v934_v16  ;;  %v210_v53 = vld [vmem:[#allocation5 + $0x4d0] sm:$0xff]  ;;  %v225_v55 = vld [vmem:[#allocation5 + $0x548] sm:$0xff]  ;;  %v219_v56 = vld [vmem:[#allocation5 + $0x518] sm:$0xff]  ;;  %v884_v58 = vpack.c.bf16 %v208_v50, %v200_v49 }
  0x43   :  { %v227_v57 = vld [vmem:[#allocation5 + $0x558] sm:$0xff]  ;;  %v948_v59 = vpack.c.bf16 %v210_v53, %v202_v51  ;;  %v886_v60 = vpack.c.bf16 %v225_v55, %v217_v54  ;;  %v216_v61 = vld [vmem:[#allocation5 + $0x500] sm:$0xff]  ;;  %v218_v63 = vld [vmem:[#allocation5 + $0x510] sm:$0xff] }
  0x44   :  { %873 = vmatpush1.bf16.msra.mxu0 %v872_v22  ;;  %v224_v62 = vld [vmem:[#allocation5 + $0x540] sm:$0xff]  ;;  %v950_v0 = vpack.c.bf16 %v227_v57, %v219_v56  ;;  %v226_v1 = vld [vmem:[#allocation5 + $0x550] sm:$0xff]  ;;  %v233_v2 = vld [vmem:[#allocation5 + $0x588] sm:$0xff] }
  0x45   :  { %937 = vmatpush1.bf16.msra.mxu1 %v936_v23  ;;  %875 = vmatprep.subr.bf16.mxu0 %v874_v24  ;;  %v241_v3 = vld [vmem:[#allocation5 + $0x5c8] sm:$0xff]  ;;  %v235_v4 = vld [vmem:[#allocation5 + $0x598] sm:$0xff]  ;;  %v888_v6 = vpack.c.bf16 %v224_v62, %v216_v61  ;;  %v232_v7 = vld [vmem:[#allocation5 + $0x580] sm:$0xff]  ;;  %v952_v8 = vpack.c.bf16 %v226_v1, %v218_v63 }
  0x46   :  { %939 = vmatprep.subr.bf16.mxu1 %v938_v28  ;;  %v243_v5 = vld [vmem:[#allocation5 + $0x5d8] sm:$0xff]  ;;  %v890_v9 = vpack.c.bf16 %v241_v3, %v233_v2  ;;  %v240_v10 = vld [vmem:[#allocation5 + $0x5c0] sm:$0xff]  ;;  %v234_v11 = vld [vmem:[#allocation5 + $0x590] sm:$0xff] }
  0x47   :  { %v242_v12 = vld [vmem:[#allocation5 + $0x5d0] sm:$0xff]  ;;  %v954_v13 = vpack.c.bf16 %v243_v5, %v235_v4  ;;  %v249_v14 = vld [vmem:[#allocation5 + $0x608] sm:$0xff]  ;;  %v251_v17 = vld [vmem:[#allocation5 + $0x618] sm:$0xff]  ;;  %v892_v19 = vpack.c.bf16 %v240_v10, %v232_v7 }
  0x48   :  { %877 = vmatpush1.bf16.msra.mxu0 %v876_v34  ;;  %v257_v15 = vld [vmem:[#allocation5 + $0x648] sm:$0xff]  ;;  %v259_v18 = vld [vmem:[#allocation5 + $0x658] sm:$0xff]  ;;  %v956_v20 = vpack.c.bf16 %v242_v12, %v234_v11  ;;  %v248_v22 = vld [vmem:[#allocation5 + $0x600] sm:$0xff] }
  0x49   :  { %941 = vmatpush1.bf16.msra.mxu1 %v940_v35  ;;  %879 = vmatprep.subr.bf16.mxu0 %v878_v36  ;;  %v1230_v16 = vld [vmem:[#allocation2 + $0x8] sm:$0xff]  ;;  %v894_v21 = vpack.c.bf16 %v257_v15, %v249_v14  ;;  %v256_v23 = vld [vmem:[#allocation5 + $0x640] sm:$0xff]  ;;  %v250_v24 = vld [vmem:[#allocation5 + $0x610] sm:$0xff]  ;;  %v958_v25 = vpack.c.bf16 %v259_v18, %v251_v17 }
  0x4a   :  { %943 = vmatprep.subr.bf16.mxu1 %v942_v40  ;;  %376 = vmatprep.mubr.f32.mxu0 %v1230_v16  ;;  %v258_v26 = vld [vmem:[#allocation5 + $0x650] sm:$0xff]  ;;  %v265_v27 = vld [vmem:[#allocation5 + $0x688] sm:$0xff]  ;;  %v267_v29 = vld [vmem:[#allocation5 + $0x698] sm:$0xff]  ;;  %v896_v31 = vpack.c.bf16 %v256_v23, %v248_v22 }
  0x4b   :  { %489 = vmatprep.mubr.f32.mxu1 %v1230_v16  ;;  %v273_v28 = vld [vmem:[#allocation5 + $0x6c8] sm:$0xff]  ;;  %v275_v30 = vld [vmem:[#allocation5 + $0x6d8] sm:$0xff]  ;;  %v960_v32 = vpack.c.bf16 %v258_v26, %v250_v24  ;;  %v264_v34 = vld [vmem:[#allocation5 + $0x680] sm:$0xff] }
  0x4c   :  { %881 = vmatpush1.bf16.msra.mxu0 %v880_v46  ;;  %v898_v33 = vpack.c.bf16 %v273_v28, %v265_v27  ;;  %v272_v35 = vld [vmem:[#allocation5 + $0x6c0] sm:$0xff]  ;;  %v266_v36 = vld [vmem:[#allocation5 + $0x690] sm:$0xff]  ;;  %v962_v37 = vpack.c.bf16 %v275_v30, %v267_v29  ;;  %v281_v39 = vld [vmem:[#allocation5 + $0x708] sm:$0xff] }
  0x4d   :  { %945 = vmatpush1.bf16.msra.mxu1 %v944_v47  ;;  %883 = vmatprep.subr.bf16.mxu0 %v882_v48  ;;  %v274_v38 = vld [vmem:[#allocation5 + $0x6d0] sm:$0xff]  ;;  %v289_v40 = vld [vmem:[#allocation5 + $0x748] sm:$0xff]  ;;  %v283_v41 = vld [vmem:[#allocation5 + $0x718] sm:$0xff]  ;;  %v900_v43 = vpack.c.bf16 %v272_v35, %v264_v34 }
  0x4e   :  { %947 = vmatprep.subr.bf16.mxu1 %v946_v52  ;;  %v291_v42 = vld [vmem:[#allocation5 + $0x758] sm:$0xff]  ;;  %v964_v44 = vpack.c.bf16 %v274_v38, %v266_v36  ;;  %v902_v45 = vpack.c.bf16 %v289_v40, %v281_v39  ;;  %v280_v46 = vld [vmem:[#allocation5 + $0x700] sm:$0xff]  ;;  %v282_v48 = vld [vmem:[#allocation5 + $0x710] sm:$0xff] }
  0x4f   :  { %v288_v47 = vld [vmem:[#allocation5 + $0x740] sm:$0xff]  ;;  %v966_v49 = vpack.c.bf16 %v291_v42, %v283_v41  ;;  %v290_v50 = vld [vmem:[#allocation5 + $0x750] sm:$0xff]  ;;  %v297_v51 = vld [vmem:[#allocation5 + $0x788] sm:$0xff] }
  0x50   :  { %885 = vmatpush1.bf16.msra.mxu0 %v884_v58  ;;  %v305_v52 = vld [vmem:[#allocation5 + $0x7c8] sm:$0xff]  ;;  %v299_v53 = vld [vmem:[#allocation5 + $0x798] sm:$0xff]  ;;  %v904_v55 = vpack.c.bf16 %v288_v47, %v280_v46  ;;  %v968_v56 = vpack.c.bf16 %v290_v50, %v282_v48  ;;  %v296_v58 = vld [vmem:[#allocation5 + $0x780] sm:$0xff] }
  0x51   :  { %949 = vmatpush1.bf16.msra.mxu1 %v948_v59  ;;  %887 = vmatprep.subr.bf16.mxu0 %v886_v60  ;;  %v307_v54 = vld [vmem:[#allocation5 + $0x7d8] sm:$0xff]  ;;  %v906_v57 = vpack.c.bf16 %v305_v52, %v297_v51  ;;  %v304_v59 = vld [vmem:[#allocation5 + $0x7c0] sm:$0xff]  ;;  %v298_v60 = vld [vmem:[#allocation5 + $0x790] sm:$0xff] }
  0x52   :  { %951 = vmatprep.subr.bf16.mxu1 %v950_v0  ;;  %v970_v61 = vpack.c.bf16 %v307_v54, %v299_v53  ;;  %v306_v62 = vld [vmem:[#allocation5 + $0x7d0] sm:$0xff]  ;;  %v61_v63 = vld [vmem:[#allocation5 + $0x28] sm:$0xff]  ;;  %v63_v1 = vld [vmem:[#allocation5 + $0x38] sm:$0xff]  ;;  %v908_v3 = vpack.c.bf16 %v304_v59, %v296_v58 }
  0x53   :  { %v69_v0 = vld [vmem:[#allocation5 + $0x68] sm:$0xff]  ;;  %v71_v2 = vld [vmem:[#allocation5 + $0x78] sm:$0xff]  ;;  %v972_v4 = vpack.c.bf16 %v306_v62, %v298_v60  ;;  %v68_v7 = vld [vmem:[#allocation5 + $0x60] sm:$0xff] }
  0x54   :  { %889 = vmatpush1.bf16.msra.mxu0 %v888_v6  ;;  %v974_v5 = vpack.c.bf16 %v69_v0, %v61_v63  ;;  %v60_v6 = vld [vmem:[#allocation5 + $0x20] sm:$0xff]  ;;  %v70_v10 = vld [vmem:[#allocation5 + $0x70] sm:$0xff]  ;;  %v77_v11 = vld [vmem:[#allocation5 + $0xa8] sm:$0xff] }
  0x55   :  { %953 = vmatpush1.bf16.msra.mxu1 %v952_v8  ;;  %891 = vmatprep.subr.bf16.mxu0 %v890_v9  ;;  %v62_v8 = vld [vmem:[#allocation5 + $0x30] sm:$0xff]  ;;  %v1038_v9 = vpack.c.bf16 %v71_v2, %v63_v1  ;;  %v85_v12 = vld [vmem:[#allocation5 + $0xe8] sm:$0xff]  ;;  %v87_v14 = vld [vmem:[#allocation5 + $0xf8] sm:$0xff]  ;;  %v976_v17 = vpack.c.bf16 %v68_v7, %v60_v6 }
  0x56   :  { %955 = vmatprep.subr.bf16.mxu1 %v954_v13  ;;  %v79_v13 = vld [vmem:[#allocation5 + $0xb8] sm:$0xff]  ;;  %v1234_v15 = vld [vmem:[#allocation2] sm:$0xff]  ;;  %v1040_v18 = vpack.c.bf16 %v70_v10, %v62_v8  ;;  %v78_v22 = vld [vmem:[#allocation5 + $0xb0] sm:$0xff] }
  0x57   :  { %v1042_v23 = vpack.c.bf16 %v87_v14, %v79_v13  ;;  %v86_v24 = vld [vmem:[#allocation5 + $0xf0] sm:$0xff]  ;;  %v101_v26 = vld [vmem:[#allocation5 + $0x168] sm:$0xff]  ;;  %v95_v27 = vld [vmem:[#allocation5 + $0x138] sm:$0xff] }
  0x58   :  { %893 = vmatpush1.bf16.msra.mxu0 %v892_v19  ;;  %v978_v19 = vpack.c.bf16 %v85_v12, %v77_v11  ;;  %v103_v28 = vld [vmem:[#allocation5 + $0x178] sm:$0xff]  ;;  %v92_v34 = vld [vmem:[#allocation5 + $0x120] sm:$0xff]  ;;  %v94_v36 = vld [vmem:[#allocation5 + $0x130] sm:$0xff] }
  0x59   :  { %957 = vmatpush1.bf16.msra.mxu1 %v956_v20  ;;  %895 = vmatprep.subr.bf16.mxu0 %v894_v21  ;;  %v76_v20 = vld [vmem:[#allocation5 + $0xa0] sm:$0xff]  ;;  %v1237_v29 = vld [vmem:[#allocation2 + $0x18] sm:$0xff]  ;;  %v102_v38 = vld [vmem:[#allocation5 + $0x170] sm:$0xff] }
  0x5a   :  { %959 = vmatprep.subr.bf16.mxu1 %v958_v25  ;;  %v84_v21 = vld [vmem:[#allocation5 + $0xe0] sm:$0xff]  ;;  %v93_v25 = vld [vmem:[#allocation5 + $0x128] sm:$0xff]  ;;  %v111_v41 = vld [vmem:[#allocation5 + $0x1b8] sm:$0xff]  ;;  %v1048_v46 = vpack.c.bf16 %v102_v38, %v94_v36 }
  0x5b   :  { %v980_v30 = vpack.c.bf16 %v84_v21, %v76_v20  ;;  %v100_v35 = vld [vmem:[#allocation5 + $0x160] sm:$0xff]  ;;  %v109_v39 = vld [vmem:[#allocation5 + $0x1a8] sm:$0xff]  ;;  %v119_v42 = vld [vmem:[#allocation5 + $0x1f8] sm:$0xff] }
  0x5c   :  { %897 = vmatpush1.bf16.msra.mxu0 %v896_v31  ;;  %v1240_v31 = vld [vmem:[#allocation2 + $0x10] sm:$0xff]  ;;  %v117_v40 = vld [vmem:[#allocation5 + $0x1e8] sm:$0xff]  ;;  %v108_v48 = vld [vmem:[#allocation5 + $0x1a0] sm:$0xff]  ;;  %v1050_v51 = vpack.c.bf16 %v119_v42, %v111_v41 }
  0x5d   :  { %961 = vmatpush1.bf16.msra.mxu1 %v960_v32  ;;  %899 = vmatprep.subr.bf16.mxu0 %v898_v33  ;;  %v1044_v32 = vpack.c.bf16 %v86_v24, %v78_v22  ;;  %v982_v33 = vpack.c.bf16 %v101_v26, %v93_v25  ;;  %v986_v47 = vpack.c.bf16 %v117_v40, %v109_v39  ;;  %v110_v50 = vld [vmem:[#allocation5 + $0x1b0] sm:$0xff]  ;;  %v125_v53 = vld [vmem:[#allocation5 + $0x228] sm:$0xff]  ;;  %v124_v62 = vld [vmem:[#allocation5 + $0x220] sm:$0xff] }
  0x5e   :  { %963 = vmatprep.subr.bf16.mxu1 %v962_v37  ;;  %v1046_v37 = vpack.c.bf16 %v103_v28, %v95_v27  ;;  %v118_v52 = vld [vmem:[#allocation5 + $0x1f0] sm:$0xff]  ;;  %v133_v54 = vld [vmem:[#allocation5 + $0x268] sm:$0xff]  ;;  %v132_v63 = vld [vmem:[#allocation5 + $0x260] sm:$0xff] }
  0x5f   :  { %v1256_v59 = vld [vmem:[#allocation2 + $0x30] sm:$0xff]  ;;  %v1052_v60 = vpack.c.bf16 %v118_v52, %v110_v50  ;;  %v151_v6 = vld [vmem:[#allocation5 + $0x2f8] sm:$0xff]  ;;  %v1261_v7 = vld [vmem:[#allocation2 + $0x48] sm:$0xff]  ;;  %v992_v8 = vpack.c.bf16 %v132_v63, %v124_v62 }
  0x60   :  { %901 = vmatpush1.bf16.msra.mxu0 %v900_v43  ;;  %v1245_v43 = vld [vmem:[#allocation2 + $0x28] sm:$0xff]  ;;  %v126_v0 = vld [vmem:[#allocation5 + $0x230] sm:$0xff]  ;;  %v140_v12 = vld [vmem:[#allocation5 + $0x2a0] sm:$0xff] }
  0x61   :  { %965 = vmatpush1.bf16.msra.mxu1 %v964_v44  ;;  %903 = vmatprep.subr.bf16.mxu0 %v902_v45  ;;  %v984_v44 = vpack.c.bf16 %v100_v35, %v92_v34  ;;  %v1248_v45 = vld [vmem:[#allocation2 + $0x20] sm:$0xff]  ;;  %v134_v2 = vld [vmem:[#allocation5 + $0x270] sm:$0xff]  ;;  %v165_v20 = vld [vmem:[#allocation5 + $0x368] sm:$0xff] }
  0x62   :  { %967 = vmatprep.subr.bf16.mxu1 %v966_v49  ;;  %v116_v49 = vld [vmem:[#allocation5 + $0x1e0] sm:$0xff]  ;;  %v1056_v10 = vpack.c.bf16 %v134_v2, %v126_v0  ;;  %v142_v14 = vld [vmem:[#allocation5 + $0x2b0] sm:$0xff]  ;;  %v159_v21 = vld [vmem:[#allocation5 + $0x338] sm:$0xff] }
  0x63   :  { %v988_v58 = vpack.c.bf16 %v116_v49, %v108_v48  ;;  %v148_v13 = vld [vmem:[#allocation5 + $0x2e0] sm:$0xff]  ;;  %v167_v22 = vld [vmem:[#allocation5 + $0x378] sm:$0xff]  ;;  %v1272_v25 = vld [vmem:[#allocation2 + $0x50] sm:$0xff] }
  0x64   :  { %905 = vmatpush1.bf16.msra.mxu0 %v904_v55  ;;  %v127_v55 = vld [vmem:[#allocation5 + $0x238] sm:$0xff]  ;;  %v996_v24 = vpack.c.bf16 %v148_v13, %v140_v12  ;;  %v156_v28 = vld [vmem:[#allocation5 + $0x320] sm:$0xff]  ;;  %v166_v34 = vld [vmem:[#allocation5 + $0x370] sm:$0xff] }
  0x65   :  { %969 = vmatpush1.bf16.msra.mxu1 %v968_v56  ;;  %907 = vmatprep.subr.bf16.mxu0 %v906_v57  ;;  %v135_v56 = vld [vmem:[#allocation5 + $0x278] sm:$0xff]  ;;  %v173_v35 = vld [vmem:[#allocation5 + $0x3a8] sm:$0xff]  ;;  %v1280_v41 = vld [vmem:[#allocation2 + $0x60] sm:$0xff] }
  0x66   :  { %971 = vmatprep.subr.bf16.mxu1 %v970_v61  ;;  %v1253_v57 = vld [vmem:[#allocation2 + $0x38] sm:$0xff]  ;;  %v990_v61 = vpack.c.bf16 %v133_v54, %v125_v53  ;;  %v1054_v1 = vpack.c.bf16 %v135_v56, %v127_v55  ;;  %v181_v36 = vld [vmem:[#allocation5 + $0x3e8] sm:$0xff]  ;;  %v174_v48 = vld [vmem:[#allocation5 + $0x3b0] sm:$0xff] }
  0x67   :  { %v183_v38 = vld [vmem:[#allocation5 + $0x3f8] sm:$0xff]  ;;  %v1277_v39 = vld [vmem:[#allocation2 + $0x68] sm:$0xff]  ;;  %v182_v50 = vld [vmem:[#allocation5 + $0x3f0] sm:$0xff] }
  0x68   :  { %909 = vmatpush1.bf16.msra.mxu0 %v908_v3  ;;  %v141_v3 = vld [vmem:[#allocation5 + $0x2a8] sm:$0xff]  ;;  %v191_v53 = vld [vmem:[#allocation5 + $0x438] sm:$0xff]  ;;  %v188_v62 = vld [vmem:[#allocation5 + $0x420] sm:$0xff] }
  0x69   :  { %973 = vmatpush1.bf16.msra.mxu1 %v972_v4  ;;  %975 = vmatprep.subr.bf16.mxu0 %v974_v5  ;;  %v149_v4 = vld [vmem:[#allocation5 + $0x2e8] sm:$0xff]  ;;  %v143_v5 = vld [vmem:[#allocation5 + $0x2b8] sm:$0xff]  ;;  %v196_v63 = vld [vmem:[#allocation5 + $0x460] sm:$0xff] }
  0x6a   :  { %1039 = vmatprep.subr.bf16.mxu1 %v1038_v9  ;;  %v1264_v9 = vld [vmem:[#allocation2 + $0x40] sm:$0xff]  ;;  %v994_v11 = vpack.c.bf16 %v149_v4, %v141_v3  ;;  %v197_v52 = vld [vmem:[#allocation5 + $0x468] sm:$0xff]  ;;  %v199_v54 = vld [vmem:[#allocation5 + $0x478] sm:$0xff] }
  0x6b   :  { %377 = vmatmul.mubr.f32.vlgmr.msra.gmra.mrb[0].mxu0 %v1234_v15  ;;  %v1285_v55 = vld [vmem:[#allocation2 + $0x78] sm:$0xff]  ;;  %v190_v0 = vld [vmem:[#allocation5 + $0x430] sm:$0xff]  ;;  %v205_v3 = vld [vmem:[#allocation5 + $0x4a8] sm:$0xff] }
  0x6c   :  { %490 = vmatmul.mubr.f32.vlgmr.msra.gmra.mrb[0].mxu1 %v1234_v15  ;;  %977 = vmatpush1.bf16.msra.mxu0 %v976_v17  ;;  %v1058_v17 = vpack.c.bf16 %v151_v6, %v143_v5  ;;  %v198_v2 = vld [vmem:[#allocation5 + $0x470] sm:$0xff]  ;;  %v213_v4 = vld [vmem:[#allocation5 + $0x4e8] sm:$0xff]  ;;  %v207_v5 = vld [vmem:[#allocation5 + $0x4b8] sm:$0xff] }
  0x6d   :  { %1041 = vmatpush1.bf16.msra.mxu1 %v1040_v18  ;;  %979 = vmatprep.subr.bf16.mxu0 %v978_v19  ;;  %v150_v18 = vld [vmem:[#allocation5 + $0x2f0] sm:$0xff]  ;;  %v157_v19 = vld [vmem:[#allocation5 + $0x328] sm:$0xff]  ;;  %v215_v6 = vld [vmem:[#allocation5 + $0x4f8] sm:$0xff] }
  0x6e   :  { %1043 = vmatprep.subr.bf16.mxu1 %v1042_v23  ;;  %382 = vmatprep.mubr.f32.mxu0 %v1237_v29  ;;  %v1269_v23 = vld [vmem:[#allocation2 + $0x58] sm:$0xff]  ;;  %v1060_v26 = vpack.c.bf16 %v150_v18, %v142_v14  ;;  %v998_v27 = vpack.c.bf16 %v165_v20, %v157_v19  ;;  %v204_v12 = vld [vmem:[#allocation5 + $0x4a0] sm:$0xff]  ;;  %v206_v14 = vld [vmem:[#allocation5 + $0x4b0] sm:$0xff] }
  0x6f   :  { %495 = vmatprep.mubr.f32.mxu1 %v1237_v29  ;;  %383 = vmatmul.mubr.f32.gmra.mrb[2].mxu0 %v1240_v31  ;;  %v212_v13 = vld [vmem:[#allocation5 + $0x4e0] sm:$0xff]  ;;  %v214_v18 = vld [vmem:[#allocation5 + $0x4f0] sm:$0xff]  ;;  %v221_v19 = vld [vmem:[#allocation5 + $0x528] sm:$0xff] }
  0x70   :  { %981 = vmatpush1.bf16.msra.mxu0 %v980_v30  ;;  %496 = vmatmul.mubr.f32.gmra.mrb[2].mxu1 %v1240_v31  ;;  %v164_v30 = vld [vmem:[#allocation5 + $0x360] sm:$0xff]  ;;  %v229_v20 = vld [vmem:[#allocation5 + $0x568] sm:$0xff] }
  0x71   :  { %1045 = vmatpush1.bf16.msra.mxu1 %v1044_v32  ;;  %983 = vmatprep.subr.bf16.mxu0 %v982_v33  ;;  %v158_v32 = vld [vmem:[#allocation5 + $0x330] sm:$0xff]  ;;  %v1062_v33 = vpack.c.bf16 %v167_v22, %v159_v21  ;;  %v1000_v40 = vpack.c.bf16 %v164_v30, %v156_v28  ;;  %v223_v21 = vld [vmem:[#allocation5 + $0x538] sm:$0xff]  ;;  %v220_v28 = vld [vmem:[#allocation5 + $0x520] sm:$0xff] }
  0x72   :  { %1047 = vmatprep.subr.bf16.mxu1 %v1046_v37  ;;  %388 = vmatprep.mubr.f32.mxu0 %v1245_v43  ;;  %v175_v37 = vld [vmem:[#allocation5 + $0x3b8] sm:$0xff]  ;;  %v1064_v42 = vpack.c.bf16 %v166_v34, %v158_v32  ;;  %v228_v30 = vld [vmem:[#allocation5 + $0x560] sm:$0xff]  ;;  %v222_v32 = vld [vmem:[#allocation5 + $0x530] sm:$0xff] }
  0x73   :  { %501 = vmatprep.mubr.f32.mxu1 %v1245_v43  ;;  %389 = vmatmul.mubr.f32.gmra.mrb[4].mxu0 %v1248_v45  ;;  %v1066_v49 = vpack.c.bf16 %v183_v38, %v175_v37  ;;  %v231_v22 = vld [vmem:[#allocation5 + $0x578] sm:$0xff]  ;;  %v230_v34 = vld [vmem:[#allocation5 + $0x570] sm:$0xff] }
  0x74   :  { %985 = vmatpush1.bf16.msra.mxu0 %v984_v44  ;;  %502 = vmatmul.mubr.f32.gmra.mrb[4].mxu1 %v1248_v45  ;;  %v1002_v44 = vpack.c.bf16 %v181_v36, %v173_v35  ;;  %v237_v35 = vld [vmem:[#allocation5 + $0x5a8] sm:$0xff]  ;;  %v239_v37 = vld [vmem:[#allocation5 + $0x5b8] sm:$0xff] }
  0x75   :  { %1049 = vmatpush1.bf16.msra.mxu1 %v1048_v46  ;;  %987 = vmatprep.subr.bf16.mxu0 %v986_v47  ;;  %v172_v46 = vld [vmem:[#allocation5 + $0x3a0] sm:$0xff]  ;;  %v245_v36 = vld [vmem:[#allocation5 + $0x5e8] sm:$0xff]  ;;  %v247_v38 = vld [vmem:[#allocation5 + $0x5f8] sm:$0xff] }
  0x76   :  { %1051 = vmatprep.subr.bf16.mxu1 %v1050_v51  ;;  %394 = vmatprep.mubr.f32.mxu0 %v1253_v57  ;;  %v180_v47 = vld [vmem:[#allocation5 + $0x3e0] sm:$0xff]  ;;  %v189_v51 = vld [vmem:[#allocation5 + $0x428] sm:$0xff] }
  0x77   :  { %507 = vmatprep.mubr.f32.mxu1 %v1253_v57  ;;  %395 = vmatmul.mubr.f32.gmra.mrb[6].mxu0 %v1256_v59  ;;  %v1004_v56 = vpack.c.bf16 %v180_v47, %v172_v46  ;;  %v244_v46 = vld [vmem:[#allocation5 + $0x5e0] sm:$0xff]  ;;  %v238_v47 = vld [vmem:[#allocation5 + $0x5b0] sm:$0xff] }
  0x78   :  { %989 = vmatpush1.bf16.msra.mxu0 %v988_v58  ;;  %508 = vmatmul.mubr.f32.gmra.mrb[6].mxu1 %v1256_v59  ;;  %v1288_v58 = vld [vmem:[#allocation2 + $0x70] sm:$0xff] }
  0x79   :  { %1053 = vmatpush1.bf16.msra.mxu1 %v1052_v60  ;;  %991 = vmatprep.subr.bf16.mxu0 %v990_v61  ;;  %v1068_v60 = vpack.c.bf16 %v182_v50, %v174_v48  ;;  %v1006_v61 = vpack.c.bf16 %v197_v52, %v189_v51  ;;  %v1082_v48 = vpack.c.bf16 %v247_v38, %v239_v37  ;;  %v253_v50 = vld [vmem:[#allocation5 + $0x628] sm:$0xff]  ;;  %v255_v52 = vld [vmem:[#allocation5 + $0x638] sm:$0xff] }
  0x7a   :  { %1055 = vmatprep.subr.bf16.mxu1 %v1054_v1  ;;  %400 = vmatprep.mubr.f32.mxu0 %v1261_v7  ;;  %v1070_v1 = vpack.c.bf16 %v199_v54, %v191_v53  ;;  %v261_v51 = vld [vmem:[#allocation5 + $0x668] sm:$0xff]  ;;  %v263_v53 = vld [vmem:[#allocation5 + $0x678] sm:$0xff] }
  0x7b   :  { %513 = vmatprep.mubr.f32.mxu1 %v1261_v7  ;;  %401 = vmatmul.mubr.f32.gmra.mrb[8].mxu0 %v1264_v9  ;;  %v311_v37 = vld [vmem:[#allocation5 + $0x7f8] sm:$0xff] }
  0x7c   :  { %993 = vmatpush1.bf16.msra.mxu0 %v992_v8  ;;  %514 = vmatmul.mubr.f32.gmra.mrb[8].mxu1 %v1264_v9  ;;  %v1008_v8 = vpack.c.bf16 %v196_v63, %v188_v62  ;;  %v260_v62 = vld [vmem:[#allocation5 + $0x660] sm:$0xff]  ;;  %v254_v63 = vld [vmem:[#allocation5 + $0x630] sm:$0xff] }
  0x7d   :  { %1057 = vmatpush1.bf16.msra.mxu1 %v1056_v10  ;;  %995 = vmatprep.subr.bf16.mxu0 %v994_v11  ;;  %v1072_v10 = vpack.c.bf16 %v198_v2, %v190_v0  ;;  %v1010_v11 = vpack.c.bf16 %v213_v4, %v205_v3  ;;  %v1086_v0 = vpack.c.bf16 %v263_v53, %v255_v52  ;;  %v269_v2 = vld [vmem:[#allocation5 + $0x6a8] sm:$0xff]  ;;  %v271_v4 = vld [vmem:[#allocation5 + $0x6b8] sm:$0xff] }
  0x7e   :  { %1059 = vmatprep.subr.bf16.mxu1 %v1058_v17  ;;  %406 = vmatprep.mubr.f32.mxu0 %v1269_v23  ;;  %v1074_v17 = vpack.c.bf16 %v215_v6, %v207_v5  ;;  %v277_v3 = vld [vmem:[#allocation5 + $0x6e8] sm:$0xff]  ;;  %v279_v5 = vld [vmem:[#allocation5 + $0x6f8] sm:$0xff] }
  0x7f   :  { %519 = vmatprep.mubr.f32.mxu1 %v1269_v23  ;;  %407 = vmatmul.mubr.f32.gmra.mrb[10].mxu0 %v1272_v25 }
  0x80   :  { %997 = vmatpush1.bf16.msra.mxu0 %v996_v24  ;;  %520 = vmatmul.mubr.f32.gmra.mrb[10].mxu1 %v1272_v25  ;;  %v1012_v24 = vpack.c.bf16 %v212_v13, %v204_v12  ;;  %v276_v12 = vld [vmem:[#allocation5 + $0x6e0] sm:$0xff]  ;;  %v270_v13 = vld [vmem:[#allocation5 + $0x6b0] sm:$0xff] }
  0x81   :  { %1061 = vmatpush1.bf16.msra.mxu1 %v1060_v26  ;;  %999 = vmatprep.subr.bf16.mxu0 %v998_v27  ;;  %v1076_v26 = vpack.c.bf16 %v214_v18, %v206_v14  ;;  %v1014_v27 = vpack.c.bf16 %v229_v20, %v221_v19  ;;  %v1090_v14 = vpack.c.bf16 %v279_v5, %v271_v4  ;;  %v285_v18 = vld [vmem:[#allocation5 + $0x728] sm:$0xff]  ;;  %v287_v20 = vld [vmem:[#allocation5 + $0x738] sm:$0xff] }
  0x82   :  { %1063 = vmatprep.subr.bf16.mxu1 %v1062_v33  ;;  %412 = vmatprep.mubr.f32.mxu0 %v1277_v39  ;;  %v1078_v33 = vpack.c.bf16 %v231_v22, %v223_v21  ;;  %v293_v19 = vld [vmem:[#allocation5 + $0x768] sm:$0xff]  ;;  %v295_v21 = vld [vmem:[#allocation5 + $0x778] sm:$0xff] }
  0x83   :  { %525 = vmatprep.mubr.f32.mxu1 %v1277_v39  ;;  %413 = vmatmul.mubr.f32.gmra.mrb[12].mxu0 %v1280_v41 }
  0x84   :  { %1001 = vmatpush1.bf16.msra.mxu0 %v1000_v40  ;;  %526 = vmatmul.mubr.f32.gmra.mrb[12].mxu1 %v1280_v41  ;;  %v1016_v40 = vpack.c.bf16 %v228_v30, %v220_v28  ;;  %v292_v28 = vld [vmem:[#allocation5 + $0x760] sm:$0xff]  ;;  %v286_v30 = vld [vmem:[#allocation5 + $0x730] sm:$0xff] }
  0x85   :  { %1065 = vmatpush1.bf16.msra.mxu1 %v1064_v42  ;;  %1003 = vmatprep.subr.bf16.mxu0 %v1002_v44  ;;  %v1018_v42 = vpack.c.bf16 %v245_v36, %v237_v35  ;;  %v236_v44 = vld [vmem:[#allocation5 + $0x5a0] sm:$0xff]  ;;  %v309_v35 = vld [vmem:[#allocation5 + $0x7e8] sm:$0xff]  ;;  %v303_v36 = vld [vmem:[#allocation5 + $0x7b8] sm:$0xff] }
  0x86   :  { %1067 = vmatprep.subr.bf16.mxu1 %v1066_v49  ;;  %418 = vmatprep.mubr.f32.mxu0 %v1285_v55  ;;  %v246_v49 = vld [vmem:[#allocation5 + $0x5f0] sm:$0xff]  ;;  %v1020_v54 = vpack.c.bf16 %v244_v46, %v236_v44  ;;  %v308_v44 = vld [vmem:[#allocation5 + $0x7e0] sm:$0xff]  ;;  %v1098_v46 = vpack.c.bf16 %v311_v37, %v303_v36 }
  0x87   :  { %531 = vmatprep.mubr.f32.mxu1 %v1285_v55  ;;  %419 = vmatmul.mubr.f32.gmra.mrb[14].mxu0 %v1288_v58 }
  0x88   :  { %1005 = vmatpush1.bf16.msra.mxu0 %v1004_v56  ;;  %532 = vmatmul.mubr.f32.gmra.mrb[14].mxu1 %v1288_v58  ;;  %v1084_v56 = vpack.c.bf16 %v246_v49, %v238_v47  ;;  %v302_v47 = vld [vmem:[#allocation5 + $0x7b0] sm:$0xff] }
  0x89   :  { %1069 = vmatpush1.bf16.msra.mxu1 %v1068_v60  ;;  %1007 = vmatprep.subr.bf16.mxu0 %v1006_v61  ;;  %v1022_v60 = vpack.c.bf16 %v261_v51, %v253_v50  ;;  %v252_v61 = vld [vmem:[#allocation5 + $0x620] sm:$0xff] }
  0x8a   :  { %1071 = vmatprep.subr.bf16.mxu1 %v1070_v1  ;;  %602 = vmatprep.mubr.f32.mxu0 %v1230_v16  ;;  %v262_v1 = vld [vmem:[#allocation5 + $0x670] sm:$0xff]  ;;  %v1024_v6 = vpack.c.bf16 %v260_v62, %v252_v61 }
  0x8b   :  { %715 = vmatprep.mubr.f32.mxu1 %v1230_v16  ;;  %v1080_v16 = vpack.c.bf16 %v230_v34, %v222_v32  ;;  %v1094_v32 = vpack.c.bf16 %v295_v21, %v287_v20  ;;  %v301_v34 = vld [vmem:[#allocation5 + $0x7a8] sm:$0xff] }
  0x8c   :  { %1009 = vmatpush1.bf16.msra.mxu0 %v1008_v8  ;;  %v1088_v8 = vpack.c.bf16 %v262_v1, %v254_v63 }
  0x8d   :  { %1073 = vmatpush1.bf16.msra.mxu1 %v1072_v10  ;;  %1011 = vmatprep.subr.bf16.mxu0 %v1010_v11  ;;  %v1026_v10 = vpack.c.bf16 %v277_v3, %v269_v2  ;;  %v268_v11 = vld [vmem:[#allocation5 + $0x6a0] sm:$0xff] }
  0x8e   :  { %1075 = vmatprep.subr.bf16.mxu1 %v1074_v17  ;;  %v278_v17 = vld [vmem:[#allocation5 + $0x6f0] sm:$0xff]  ;;  %v1028_v22 = vpack.c.bf16 %v276_v12, %v268_v11 }
  0x90   :  { %1013 = vmatpush1.bf16.msra.mxu0 %v1012_v24  ;;  %v1092_v24 = vpack.c.bf16 %v278_v17, %v270_v13 }
  0x91   :  { %1077 = vmatpush1.bf16.msra.mxu1 %v1076_v26  ;;  %1015 = vmatprep.subr.bf16.mxu0 %v1014_v27  ;;  %v1030_v26 = vpack.c.bf16 %v293_v19, %v285_v18  ;;  %v284_v27 = vld [vmem:[#allocation5 + $0x720] sm:$0xff] }
  0x92   :  { %1079 = vmatprep.subr.bf16.mxu1 %v1078_v33  ;;  %v294_v33 = vld [vmem:[#allocation5 + $0x770] sm:$0xff]  ;;  %v1032_v38 = vpack.c.bf16 %v292_v28, %v284_v27 }
  0x94   :  { %1017 = vmatpush1.bf16.msra.mxu0 %v1016_v40  ;;  %v1096_v40 = vpack.c.bf16 %v294_v33, %v286_v30 }
  0x95   :  { %1081 = vmatpush1.bf16.msra.mxu1 %v1080_v16  ;;  %1019 = vmatprep.subr.bf16.mxu0 %v1018_v42  ;;  %v1034_v16 = vpack.c.bf16 %v309_v35, %v301_v34  ;;  %v300_v42 = vld [vmem:[#allocation5 + $0x7a0] sm:$0xff] }
  0x96   :  { %1083 = vmatprep.subr.bf16.mxu1 %v1082_v48  ;;  %v310_v48 = vld [vmem:[#allocation5 + $0x7f0] sm:$0xff]  ;;  %v1036_v49 = vpack.c.bf16 %v308_v44, %v300_v42 }
  0x97   :  { %v1100_v50 = vpack.c.bf16 %v310_v48, %v302_v47 }
  0x98   :  { %1021 = vmatpush1.bf16.msra.mxu0 %v1020_v54 }
  0x99   :  { %1085 = vmatpush1.bf16.msra.mxu1 %v1084_v56  ;;  %1023 = vmatprep.subr.bf16.mxu0 %v1022_v60 }
  0x9a   :  { %1087 = vmatprep.subr.bf16.mxu1 %v1086_v0 }
  0x9c   :  { %1025 = vmatpush1.bf16.msra.mxu0 %v1024_v6 }
  0x9d   :  { %1089 = vmatpush1.bf16.msra.mxu1 %v1088_v8  ;;  %1027 = vmatprep.subr.bf16.mxu0 %v1026_v10 }
  0x9e   :  { %1091 = vmatprep.subr.bf16.mxu1 %v1090_v14 }
  0xa0   :  { %1029 = vmatpush1.bf16.msra.mxu0 %v1028_v22 }
  0xa1   :  { %1093 = vmatpush1.bf16.msra.mxu1 %v1092_v24  ;;  %1031 = vmatprep.subr.bf16.mxu0 %v1030_v26 }
  0xa2   :  { %1095 = vmatprep.subr.bf16.mxu1 %v1094_v32 }
  0xa4   :  { %1033 = vmatpush1.bf16.msra.mxu0 %v1032_v38 }
  0xa5   :  { %1097 = vmatpush1.bf16.msra.mxu1 %v1096_v40  ;;  %1035 = vmatprep.subr.bf16.mxu0 %v1034_v16 }
  0xa6   :  { %1099 = vmatprep.subr.bf16.mxu1 %v1098_v46 }
  0xa8   :  { %1037 = vmatpush1.bf16.msra.mxu0 %v1036_v49 }
  0xa9   :  { %1101 = vmatpush1.bf16.msra.mxu1 %v1100_v50 }
  0xab   :  { %603 = vmatmul.mubr.f32.vlgmr.msra.gmra.mrb[16].mxu0 %v1234_v15 }
  0xac   :  { %716 = vmatmul.mubr.f32.vlgmr.msra.gmra.mrb[16].mxu1 %v1234_v15  ;;  %608 = vmatprep.mubr.f32.mxu0 %v1237_v29 }
  0xad   :  { %721 = vmatprep.mubr.f32.mxu1 %v1237_v29 }
  0xaf   :  { %609 = vmatmul.mubr.f32.gmra.mrb[18].mxu0 %v1240_v31 }
  0xb0   :  { %722 = vmatmul.mubr.f32.gmra.mrb[18].mxu1 %v1240_v31  ;;  %614 = vmatprep.mubr.f32.mxu0 %v1245_v43 }
  0xb1   :  { %727 = vmatprep.mubr.f32.mxu1 %v1245_v43 }
  0xb3   :  { %615 = vmatmul.mubr.f32.gmra.mrb[20].mxu0 %v1248_v45 }
  0xb4   :  { %728 = vmatmul.mubr.f32.gmra.mrb[20].mxu1 %v1248_v45  ;;  %620 = vmatprep.mubr.f32.mxu0 %v1253_v57 }
  0xb5   :  { %733 = vmatprep.mubr.f32.mxu1 %v1253_v57 }
  0xb7   :  { %621 = vmatmul.mubr.f32.gmra.mrb[22].mxu0 %v1256_v59 }
  0xb8   :  { %734 = vmatmul.mubr.f32.gmra.mrb[22].mxu1 %v1256_v59  ;;  %626 = vmatprep.mubr.f32.mxu0 %v1261_v7 }
  0xb9   :  { %739 = vmatprep.mubr.f32.mxu1 %v1261_v7 }
  0xbb   :  { %627 = vmatmul.mubr.f32.gmra.mrb[24].mxu0 %v1264_v9 }
  0xbc   :  { %740 = vmatmul.mubr.f32.gmra.mrb[24].mxu1 %v1264_v9  ;;  %632 = vmatprep.mubr.f32.mxu0 %v1269_v23 }
  0xbd   :  { %745 = vmatprep.mubr.f32.mxu1 %v1269_v23 }
  0xbf   :  { %633 = vmatmul.mubr.f32.gmra.mrb[26].mxu0 %v1272_v25 }
  0xc0   :  { %746 = vmatmul.mubr.f32.gmra.mrb[26].mxu1 %v1272_v25  ;;  %638 = vmatprep.mubr.f32.mxu0 %v1277_v39 }
  0xc1   :  { %751 = vmatprep.mubr.f32.mxu1 %v1277_v39 }
  0xc3   :  { %639 = vmatmul.mubr.f32.gmra.mrb[28].mxu0 %v1280_v41 }
  0xc4   :  { %752 = vmatmul.mubr.f32.gmra.mrb[28].mxu1 %v1280_v41  ;;  %644 = vmatprep.mubr.f32.mxu0 %v1285_v55 }
  0xc5   :  { %757 = vmatprep.mubr.f32.mxu1 %v1285_v55 }
  0xc7   :  { %645 = vmatmul.mubr.f32.gmra.mrb[30].mxu0 %v1288_v58 }
  0xc8   :  { %758 = vmatmul.mubr.f32.gmra.mrb[30].mxu1 %v1288_v58 }
 0x13e   :  { %v378_v15 = vpop.f32.mrb[0].mxu0 }
 0x13f   :  { %764 = vst [vmem:[#allocation7] sm:$0xff] %v378_v15  ;;  %v491_v29 = vpop.f32.mrb[0].mxu1  ;;  %v380_v31 = vpop.f32.mrb[1].mxu0 }
 0x140   :  { %766 = vst [vmem:[#allocation7 + $0x10] sm:$0xff] %v491_v29  ;;  %765 = vst [vmem:[#allocation7 + $0x8] sm:$0xff] %v380_v31  ;;  %v493_v43 = vpop.f32.mrb[1].mxu1 }
 0x141   :  { %767 = vst [vmem:[#allocation7 + $0x18] sm:$0xff] %v493_v43 }
 0x142   :  { %v384_v45 = vpop.f32.mrb[2].mxu0 }
 0x143   :  { %772 = vst [vmem:[#allocation7 + $0x40] sm:$0xff] %v384_v45  ;;  %v497_v57 = vpop.f32.mrb[2].mxu1  ;;  %v386_v59 = vpop.f32.mrb[3].mxu0 }
 0x144   :  { %774 = vst [vmem:[#allocation7 + $0x50] sm:$0xff] %v497_v57  ;;  %773 = vst [vmem:[#allocation7 + $0x48] sm:$0xff] %v386_v59  ;;  %v499_v7 = vpop.f32.mrb[3].mxu1 }
 0x145   :  { %775 = vst [vmem:[#allocation7 + $0x58] sm:$0xff] %v499_v7 }
 0x146   :  { %v390_v9 = vpop.f32.mrb[4].mxu0 }
 0x147   :  { %780 = vst [vmem:[#allocation7 + $0x80] sm:$0xff] %v390_v9  ;;  %v503_v23 = vpop.f32.mrb[4].mxu1  ;;  %v392_v25 = vpop.f32.mrb[5].mxu0 }
 0x148   :  { %782 = vst [vmem:[#allocation7 + $0x90] sm:$0xff] %v503_v23  ;;  %781 = vst [vmem:[#allocation7 + $0x88] sm:$0xff] %v392_v25  ;;  %v505_v39 = vpop.f32.mrb[5].mxu1 }
 0x149   :  { %783 = vst [vmem:[#allocation7 + $0x98] sm:$0xff] %v505_v39 }
 0x14a   :  { %v396_v41 = vpop.f32.mrb[6].mxu0 }
 0x14b   :  { %788 = vst [vmem:[#allocation7 + $0xc0] sm:$0xff] %v396_v41  ;;  %v509_v55 = vpop.f32.mrb[6].mxu1  ;;  %v398_v58 = vpop.f32.mrb[7].mxu0 }
 0x14c   :  { %790 = vst [vmem:[#allocation7 + $0xd0] sm:$0xff] %v509_v55  ;;  %789 = vst [vmem:[#allocation7 + $0xc8] sm:$0xff] %v398_v58  ;;  %v511_v51 = vpop.f32.mrb[7].mxu1 }
 0x14d   :  { %791 = vst [vmem:[#allocation7 + $0xd8] sm:$0xff] %v511_v51 }
 0x14e   :  { %v402_v52 = vpop.f32.mrb[8].mxu0 }
 0x14f   :  { %796 = vst [vmem:[#allocation7 + $0x100] sm:$0xff] %v402_v52  ;;  %v515_v53 = vpop.f32.mrb[8].mxu1  ;;  %v404_v54 = vpop.f32.mrb[9].mxu0 }
 0x150   :  { %798 = vst [vmem:[#allocation7 + $0x110] sm:$0xff] %v515_v53  ;;  %797 = vst [vmem:[#allocation7 + $0x108] sm:$0xff] %v404_v54  ;;  %v517_v56 = vpop.f32.mrb[9].mxu1 }
 0x151   :  { %799 = vst [vmem:[#allocation7 + $0x118] sm:$0xff] %v517_v56 }
 0x152   :  { %v408_v60 = vpop.f32.mrb[10].mxu0 }
 0x153   :  { %804 = vst [vmem:[#allocation7 + $0x140] sm:$0xff] %v408_v60  ;;  %v521_v61 = vpop.f32.mrb[10].mxu1  ;;  %v410_v62 = vpop.f32.mrb[11].mxu0 }
 0x154   :  { %806 = vst [vmem:[#allocation7 + $0x150] sm:$0xff] %v521_v61  ;;  %805 = vst [vmem:[#allocation7 + $0x148] sm:$0xff] %v410_v62  ;;  %v523_v63 = vpop.f32.mrb[11].mxu1 }
 0x155   :  { %807 = vst [vmem:[#allocation7 + $0x158] sm:$0xff] %v523_v63 }
 0x156   :  { %v414_v0 = vpop.f32.mrb[12].mxu0 }
 0x157   :  { %812 = vst [vmem:[#allocation7 + $0x180] sm:$0xff] %v414_v0  ;;  %v527_v1 = vpop.f32.mrb[12].mxu1  ;;  %v416_v2 = vpop.f32.mrb[13].mxu0 }
 0x158   :  { %814 = vst [vmem:[#allocation7 + $0x190] sm:$0xff] %v527_v1  ;;  %813 = vst [vmem:[#allocation7 + $0x188] sm:$0xff] %v416_v2  ;;  %v529_v3 = vpop.f32.mrb[13].mxu1 }
 0x159   :  { %815 = vst [vmem:[#allocation7 + $0x198] sm:$0xff] %v529_v3 }
 0x15a   :  { %v420_v4 = vpop.f32.mrb[14].mxu0 }
 0x15b   :  { %820 = vst [vmem:[#allocation7 + $0x1c0] sm:$0xff] %v420_v4  ;;  %v533_v5 = vpop.f32.mrb[14].mxu1  ;;  %v422_v6 = vpop.f32.mrb[15].mxu0 }
 0x15c   :  { %822 = vst [vmem:[#allocation7 + $0x1d0] sm:$0xff] %v533_v5  ;;  %821 = vst [vmem:[#allocation7 + $0x1c8] sm:$0xff] %v422_v6  ;;  %v535_v8 = vpop.f32.mrb[15].mxu1 }
 0x15d   :  { %823 = vst [vmem:[#allocation7 + $0x1d8] sm:$0xff] %v535_v8 }
 0x17e   :  { %v604_v10 = vpop.f32.mrb[16].mxu0 }
 0x17f   :  { %768 = vst [vmem:[#allocation7 + $0x20] sm:$0xff] %v604_v10  ;;  %v717_v11 = vpop.f32.mrb[16].mxu1  ;;  %v606_v12 = vpop.f32.mrb[17].mxu0 }
 0x180   :  { %770 = vst [vmem:[#allocation7 + $0x30] sm:$0xff] %v717_v11  ;;  %769 = vst [vmem:[#allocation7 + $0x28] sm:$0xff] %v606_v12  ;;  %v719_v13 = vpop.f32.mrb[17].mxu1 }
 0x181   :  { %771 = vst [vmem:[#allocation7 + $0x38] sm:$0xff] %v719_v13 }
 0x182   :  { %v610_v14 = vpop.f32.mrb[18].mxu0 }
 0x183   :  { %776 = vst [vmem:[#allocation7 + $0x60] sm:$0xff] %v610_v14  ;;  %v723_v17 = vpop.f32.mrb[18].mxu1  ;;  %v612_v18 = vpop.f32.mrb[19].mxu0 }
 0x184   :  { %778 = vst [vmem:[#allocation7 + $0x70] sm:$0xff] %v723_v17  ;;  %777 = vst [vmem:[#allocation7 + $0x68] sm:$0xff] %v612_v18  ;;  %v725_v19 = vpop.f32.mrb[19].mxu1 }
 0x185   :  { %779 = vst [vmem:[#allocation7 + $0x78] sm:$0xff] %v725_v19 }
 0x186   :  { %v616_v20 = vpop.f32.mrb[20].mxu0 }
 0x187   :  { %784 = vst [vmem:[#allocation7 + $0xa0] sm:$0xff] %v616_v20  ;;  %v729_v21 = vpop.f32.mrb[20].mxu1  ;;  %v618_v22 = vpop.f32.mrb[21].mxu0 }
 0x188   :  { %786 = vst [vmem:[#allocation7 + $0xb0] sm:$0xff] %v729_v21  ;;  %785 = vst [vmem:[#allocation7 + $0xa8] sm:$0xff] %v618_v22  ;;  %v731_v24 = vpop.f32.mrb[21].mxu1 }
 0x189   :  { %787 = vst [vmem:[#allocation7 + $0xb8] sm:$0xff] %v731_v24 }
 0x18a   :  { %v622_v26 = vpop.f32.mrb[22].mxu0 }
 0x18b   :  { %792 = vst [vmem:[#allocation7 + $0xe0] sm:$0xff] %v622_v26  ;;  %v735_v27 = vpop.f32.mrb[22].mxu1  ;;  %v624_v28 = vpop.f32.mrb[23].mxu0 }
 0x18c   :  { %794 = vst [vmem:[#allocation7 + $0xf0] sm:$0xff] %v735_v27  ;;  %793 = vst [vmem:[#allocation7 + $0xe8] sm:$0xff] %v624_v28  ;;  %v737_v30 = vpop.f32.mrb[23].mxu1 }
 0x18d   :  { %795 = vst [vmem:[#allocation7 + $0xf8] sm:$0xff] %v737_v30 }
 0x18e   :  { %v628_v32 = vpop.f32.mrb[24].mxu0 }
 0x18f   :  { %800 = vst [vmem:[#allocation7 + $0x120] sm:$0xff] %v628_v32  ;;  %v741_v33 = vpop.f32.mrb[24].mxu1  ;;  %v630_v34 = vpop.f32.mrb[25].mxu0 }
 0x190   :  { %802 = vst [vmem:[#allocation7 + $0x130] sm:$0xff] %v741_v33  ;;  %801 = vst [vmem:[#allocation7 + $0x128] sm:$0xff] %v630_v34  ;;  %v743_v35 = vpop.f32.mrb[25].mxu1 }
 0x191   :  { %803 = vst [vmem:[#allocation7 + $0x138] sm:$0xff] %v743_v35 }
 0x192   :  { %v634_v36 = vpop.f32.mrb[26].mxu0 }
 0x193   :  { %808 = vst [vmem:[#allocation7 + $0x160] sm:$0xff] %v634_v36  ;;  %v747_v37 = vpop.f32.mrb[26].mxu1  ;;  %v636_v38 = vpop.f32.mrb[27].mxu0 }
 0x194   :  { %810 = vst [vmem:[#allocation7 + $0x170] sm:$0xff] %v747_v37  ;;  %809 = vst [vmem:[#allocation7 + $0x168] sm:$0xff] %v636_v38  ;;  %v749_v40 = vpop.f32.mrb[27].mxu1 }
 0x195   :  { %811 = vst [vmem:[#allocation7 + $0x178] sm:$0xff] %v749_v40 }
 0x196   :  { %v640_v16 = vpop.f32.mrb[28].mxu0 }
 0x197   :  { %816 = vst [vmem:[#allocation7 + $0x1a0] sm:$0xff] %v640_v16  ;;  %v753_v42 = vpop.f32.mrb[28].mxu1  ;;  %v642_v44 = vpop.f32.mrb[29].mxu0 }
 0x198   :  { %818 = vst [vmem:[#allocation7 + $0x1b0] sm:$0xff] %v753_v42  ;;  %817 = vst [vmem:[#allocation7 + $0x1a8] sm:$0xff] %v642_v44  ;;  %v755_v46 = vpop.f32.mrb[29].mxu1 }
 0x199   :  { %819 = vst [vmem:[#allocation7 + $0x1b8] sm:$0xff] %v755_v46 }
 0x19a   :  { %v646_v47 = vpop.f32.mrb[30].mxu0 }
 0x19b   :  { %824 = vst [vmem:[#allocation7 + $0x1e0] sm:$0xff] %v646_v47  ;;  %v759_v48 = vpop.f32.mrb[30].mxu1  ;;  %v648_v49 = vpop.f32.mrb[31].mxu0 }
 0x19c   :  { %826 = vst [vmem:[#allocation7 + $0x1f0] sm:$0xff] %v759_v48  ;;  %825 = vst [vmem:[#allocation7 + $0x1e8] sm:$0xff] %v648_v49  ;;  %v761_v50 = vpop.f32.mrb[31].mxu1 }
 0x19d   :  { %827 = vst [vmem:[#allocation7 + $0x1f8] sm:$0xff] %v761_v50 }
 0x19e   :  { %1164 = shalt.err (!%p1161_p6)
}
 0x19f   :  { %s1165_s12 = scalar_lea.hbm %s1343_s2, 8192 }
 0x1a0   :  { %p1166_p7 = scmp.ne.s32.totalorder %s1343_s2, %s1165_s12  ;;  %p1169_p8 = scmp.lt.u32.totalorder %s1165_s12, %s1343_s2 }
 0x1a2   :  { %p1171_p9 = pnand %p1169_p8, %p1166_p7 }
 0x1a4   :  { %1174 = shalt.err (!%p1171_p9)
}
 0x1a5   :  { %839 = dma.vmem_to_hbm [thread:$0]  %s834_s8, 8192, %s1343_s2, [#allocation4], %s1185_s0, %s1185_s0, %s1186_s5  }
 0x1a6   :  { %1179 = dma.done.wait [#allocation4], 8192  }
 0x1a7   :  { %1180 = vsyncadd [#allocation4], 4294959104 }
 0x1a8   :  { %843 = vsyncpa [#allocation3], 1 }
 0x1a9   :  { %844 = vsyncpa [#allocation6], 1 }
 0x1aa   :  { %845 = vsyncpa [#allocation4], 1 }

</bundles_post_ra>
